<compile_context>
chip_gen: v6e
topology: v6e:2x2x1
jax: 0.10.0
libtpu: 0.0.40
codegen_flags: <defaults>
</compile_context>

<pallas_src>
import functools
import math

import jax
import jax.numpy as jnp
import numpy as np
from jax import lax
from jax.experimental import pallas as pl
from jax.experimental.pallas import tpu as pltpu


# ----------------------------- shared math helpers ----------------------------

def _layernorm(x, gamma, beta, eps=1e-5):
    # PyTorch nn.LayerNorm: biased variance, eps inside sqrt.
    mu = jnp.mean(x, axis=-1, keepdims=True)
    var = jnp.mean((x - mu) * (x - mu), axis=-1, keepdims=True)
    return (x - mu) * lax.rsqrt(var + eps) * gamma + beta


def _gelu_exact(x):
    # nn.GELU() default = exact erf formulation.
    return 0.5 * x * (1.0 + lax.erf(x * (1.0 / math.sqrt(2.0))))


# ------------------------------ fused network kernel -----------------------------

def _fused_transformer_kernel(heads, dim_head,
                              x_ref, vecs_ref, wqkv_ref, wo_ref,
                              w1_ref, b1_ref, w2_ref, o_ref):
    """One grid step = one batch element; the whole depth loop runs in-kernel."""
    depth = wqkv_ref.shape[0]

    x = x_ref[0].astype(jnp.float32)                       # (N, D), explicit f32 working dtype

    for l in range(depth):                                  # static unroll over layers
        vec = vecs_ref[l]                                   # (6, D): g1, be1, bo, g2, be2, b2
        g1, be1, bo = vec[0:1], vec[1:2], vec[2:3]
        g2, be2, b2 = vec[3:4], vec[4:5], vec[5:6]

        # ---------------- PreNorm -> multi-head self-attention -> residual ----------------
        xn = _layernorm(x, g1, be1)                                          # (N, D)
        # Fused QKV projection: one matmul for all heads and all of q/k/v.
        qkv = jnp.dot(xn, wqkv_ref[l], preferred_element_type=jnp.float32)   # (N, 3*H*dh)
        wo_l = wo_ref[l]                                                     # (H*dh, D)

        acc = None
        for h in range(heads):                              # static unroll over heads
            base = 3 * dim_head * h
            q = qkv[:, base:base + dim_head]                # attention scale folded into Wq
            k = qkv[:, base + dim_head:base + 2 * dim_head]
            v = qkv[:, base + 2 * dim_head:base + 3 * dim_head]

            # q @ k^T without materializing the transpose.
            s = lax.dot_general(q, k, (((1,), (1,)), ((), ())),
                                preferred_element_type=jnp.float32)          # (N, N)
            m = jnp.max(s, axis=-1, keepdims=True)
            p = jnp.exp(s - m)
            denom = jnp.sum(p, axis=-1, keepdims=True)
            attn = p * pl.reciprocal(denom, approx=True)                     # EUP vrcp path
            ctx = jnp.dot(attn, v, preferred_element_type=jnp.float32)       # (N, dh)
            # concat-over-heads @ W_o == sum over heads of per-head projections.
            part = jnp.dot(ctx, wo_l[h * dim_head:(h + 1) * dim_head, :],
                           preferred_element_type=jnp.float32)               # (N, D)
            acc = part if acc is None else acc + part
        x = x + acc + bo                                                     # residual

        # ---------------- PreNorm -> MLP (exact-erf GELU) -> residual ----------------
        xn2 = _layernorm(x, g2, be2)
        h1 = jnp.dot(xn2, w1_ref[l], preferred_element_type=jnp.float32) + b1_ref[l]
        h1 = _gelu_exact(h1)
        x = x + jnp.dot(h1, w2_ref[l], preferred_element_type=jnp.float32) + b2

    o_ref[0] = x.astype(o_ref.dtype)


# --------------------------------- host wrapper --------------------------------

def transformer_forward(x, kp, *, heads, dim_head):
    """x: (B, N, D); kp: packed kernel parameters (see pack_params)."""
    B, N, D = x.shape

    def full_spec(arr):
        # Full-extent block; constant block index across the batch grid -> weights are
        # DMA'd once and stay resident in VMEM for every grid step.
        return pl.BlockSpec(arr.shape, lambda b, _nd=arr.ndim: (0,) * _nd)

    x_spec = pl.BlockSpec((1, N, D), lambda b: (b, 0, 0))

    in_specs = [
        x_spec,                 # activations (one batch element per grid step)
        full_spec(kp["vecs"]),  # packed gammas/betas/biases  (depth, 6, D)
        full_spec(kp["wqkv"]),  # fused QKV weights           (depth, D, 3*H*dh)
        full_spec(kp["wo"]),    # output projection           (depth, H*dh, D)
        full_spec(kp["w1"]),    # MLP in                      (depth, D, mlp_dim)
        full_spec(kp["b1"]),    # MLP in bias                 (depth, 1, mlp_dim)
        full_spec(kp["w2"]),    # MLP out                     (depth, mlp_dim, D)
    ]

    kernel = functools.partial(_fused_transformer_kernel, heads, dim_head)

    return pl.pallas_call(
        kernel,
        out_shape=jax.ShapeDtypeStruct((B, N, D), x.dtype),
        grid_spec=pltpu.PrefetchScalarGridSpec(
            num_scalar_prefetch=0,
            grid=(B,),                      # batch only: feeds both TCs on v7x, cheap on v5e/v6e
            in_specs=in_specs,
            out_specs=x_spec,
        ),
        compiler_params=pltpu.CompilerParams(
            dimension_semantics=("parallel",),
            vmem_limit_bytes=32 * 1024 * 1024,   # explicit budget; total footprint here ~130 KB
        ),
    )(x, kp["vecs"], kp["wqkv"], kp["wo"], kp["w1"], kp["b1"], kp["w2"])


# ------------------------------ pure-JAX reference ------------------------------

def _ref_forward(x, p):
    depth, heads, _, dim_head = p["wq"].shape
    scale = dim_head ** (-0.5)
    for l in range(depth):
        xn = _layernorm(x, p["g1"][l], p["be1"][l])
        q = jnp.einsum('bnd,hdk->bhnk', xn, p["wq"][l])
        k = jnp.einsum('bnd,hdk->bhnk', xn, p["wk"][l])
        v = jnp.einsum('bnd,hdk->bhnk', xn, p["wv"][l])
        dots = jnp.einsum('bhnd,bhmd->bhnm', q, k) * scale
        attn = jax.nn.softmax(dots, axis=-1)
        ctx = jnp.einsum('bhnm,bhmd->bhnd', attn, v)
        proj = jnp.einsum('bhnd,hdo->bno', ctx, p["wo"][l]) + p["bo"][l]
        x = x + proj
        xn2 = _layernorm(x, p["g2"][l], p["be2"][l])
        hdn = jax.nn.gelu(xn2 @ p["w1"][l] + p["b1"][l], approximate=False)
        x = x + hdn @ p["w2"][l] + p["b2"][l]
    return x


# ------------------------------ deterministic params -----------------------------

def make_params(key, depth, dim, heads, dim_head, mlp_dim):
    def one_layer(k):
        k1, k2, k3, k4, k5, k6 = jax.random.split(k, 6)
        return {
            "g1":  jnp.ones((1, dim), jnp.float32),
            "be1": jnp.zeros((1, dim), jnp.float32),
            "wq":  0.05 * jax.random.normal(k1, (heads, dim, dim_head), jnp.float32),
            "wk":  0.05 * jax.random.normal(k2, (heads, dim, dim_head), jnp.float32),
            "wv":  0.05 * jax.random.normal(k3, (heads, dim, dim_head), jnp.float32),
            "wo":  0.05 * jax.random.normal(k4, (heads, dim_head, dim), jnp.float32),
            "bo":  jnp.zeros((1, dim), jnp.float32),
            "g2":  jnp.ones((1, dim), jnp.float32),
            "be2": jnp.zeros((1, dim), jnp.float32),
            "w1":  0.05 * jax.random.normal(k5, (dim, mlp_dim), jnp.float32),
            "b1":  jnp.full((1, mlp_dim), 0.01, jnp.float32),
            "w2":  0.05 * jax.random.normal(k6, (mlp_dim, dim), jnp.float32),
            "b2":  jnp.full((1, dim), 0.01, jnp.float32),
        }
    layers = [one_layer(k) for k in jax.random.split(key, depth)]
    # Stack every parameter on a leading depth axis.
    return {name: jnp.stack([lp[name] for lp in layers], axis=0) for name in layers[0]}


def pack_params(p, heads, dim_head):
    """One-time host-side packing into the kernel's fused layout."""
    depth, _, dim, _ = p["wq"].shape
    scale = dim_head ** (-0.5)
    # Fuse Q/K/V per head (scale folded into Wq), then flatten heads into the lane dim:
    # column index = h*(3*dh) + [q | k | v].
    wqkv = jnp.concatenate([p["wq"] * scale, p["wk"], p["wv"]], axis=-1)   # (depth,H,D,3*dh)
    wqkv = jnp.transpose(wqkv, (0, 2, 1, 3)).reshape(depth, dim, heads * 3 * dim_head)
    wo = p["wo"].reshape(depth, heads * dim_head, dim)                    # (depth, H*dh, D)
    # Pack the seven tiny per-layer vectors into two arrays (6 DMAs saved per grid step).
    vecs = jnp.concatenate([p["g1"], p["be1"], p["bo"],
                            p["g2"], p["be2"], p["b2"]], axis=1)          # (depth, 6, D)
    return {"wqkv": wqkv, "wo": wo, "vecs": vecs,
            "w1": p["w1"], "b1": p["b1"], "w2": p["w2"]}


# --------------------------------------- main -------------------------------------

if __name__ == "__main__":
    B, N = 2, 8
    dim, depth, heads, dim_head, mlp_dim = 32, 2, 4, 8, 64   # inner_dim = 32

    key = jax.random.PRNGKey(0)
    key, kx = jax.random.split(key)
    x = jax.random.normal(kx, (B, N, dim), jnp.float32)
    params = make_params(key, depth, dim, heads, dim_head, mlp_dim)
    kparams = pack_params(params, heads, dim_head)

    out = jax.block_until_ready(
        transformer_forward(x, kparams, heads=heads, dim_head=dim_head))
    ref = jax.block_until_ready(_ref_forward(x, params))
    # Tolerance 5e-4: approx=True softmax reciprocal adds ~1e-4-scale error vs. exact divide.
    np.testing.assert_allclose(np.asarray(out), np.asarray(ref), rtol=5e-4, atol=5e-4)

    print("KERNEL_OK")
</pallas_src>

<mosaic_0001>
module attributes {stable_mosaic.version = 11 : i64} {
  func.func @_fused_transformer_kernel(%arg0: i32, %arg1: memref<1x8x32xf32, #tpu.memory_space<vmem>>, %arg2: memref<2x6x32xf32, #tpu.memory_space<vmem>>, %arg3: memref<2x32x96xf32, #tpu.memory_space<vmem>>, %arg4: memref<2x32x32xf32, #tpu.memory_space<vmem>>, %arg5: memref<2x32x64xf32, #tpu.memory_space<vmem>>, %arg6: memref<2x1x64xf32, #tpu.memory_space<vmem>>, %arg7: memref<2x64x32xf32, #tpu.memory_space<vmem>>, %arg8: memref<1x8x32xf32, #tpu.memory_space<vmem>>) attributes {dimension_semantics = [#tpu.dimension_semantics<parallel>], iteration_bounds = array<i64: 2>, scalar_prefetch = 0 : i64, scratch_operands = 0 : i64, tpu.core_type = #tpu.core_type<tc>, window_params = [{transform_indices = @transform_0, window_bounds = array<i64: 1, 8, 32>}, {pipeline_mode = #tpu.pipeline_mode<synchronous>, transform_indices = @transform_1, window_bounds = array<i64: 2, 6, 32>}, {pipeline_mode = #tpu.pipeline_mode<synchronous>, transform_indices = @transform_2, window_bounds = array<i64: 2, 32, 96>}, {pipeline_mode = #tpu.pipeline_mode<synchronous>, transform_indices = @transform_3, window_bounds = array<i64: 2, 32, 32>}, {pipeline_mode = #tpu.pipeline_mode<synchronous>, transform_indices = @transform_4, window_bounds = array<i64: 2, 32, 64>}, {pipeline_mode = #tpu.pipeline_mode<synchronous>, transform_indices = @transform_5, window_bounds = array<i64: 2, 1, 64>}, {pipeline_mode = #tpu.pipeline_mode<synchronous>, transform_indices = @transform_6, window_bounds = array<i64: 2, 64, 32>}, {transform_indices = @transform_7, window_bounds = array<i64: 1, 8, 32>}]} {
    %c0 = arith.constant 0 : index
    %c0_0 = arith.constant 0 : index
    %c0_1 = arith.constant 0 : index
    %0 = vector.load %arg1[%c0, %c0_0, %c0_1] : memref<1x8x32xf32, #tpu.memory_space<vmem>>, vector<1x8x32xf32>
    %1 = vector.shape_cast %0 : vector<1x8x32xf32> to vector<8x32xf32>
    %c0_2 = arith.constant 0 : index
    %c0_3 = arith.constant 0 : index
    %c0_4 = arith.constant 0 : index
    %2 = vector.load %arg2[%c0_2, %c0_3, %c0_4] : memref<2x6x32xf32, #tpu.memory_space<vmem>>, vector<1x6x32xf32>
    %3 = vector.shape_cast %2 : vector<1x6x32xf32> to vector<6x32xf32>
    %4 = vector.extract_strided_slice %3 {offsets = [0, 0], sizes = [1, 32], strides = [1, 1]} : vector<6x32xf32> to vector<1x32xf32>
    %5 = vector.extract_strided_slice %3 {offsets = [1, 0], sizes = [1, 32], strides = [1, 1]} : vector<6x32xf32> to vector<1x32xf32>
    %6 = vector.extract_strided_slice %3 {offsets = [2, 0], sizes = [1, 32], strides = [1, 1]} : vector<6x32xf32> to vector<1x32xf32>
    %7 = vector.extract_strided_slice %3 {offsets = [3, 0], sizes = [1, 32], strides = [1, 1]} : vector<6x32xf32> to vector<1x32xf32>
    %8 = vector.extract_strided_slice %3 {offsets = [4, 0], sizes = [1, 32], strides = [1, 1]} : vector<6x32xf32> to vector<1x32xf32>
    %9 = vector.extract_strided_slice %3 {offsets = [5, 0], sizes = [1, 32], strides = [1, 1]} : vector<6x32xf32> to vector<1x32xf32>
    %cst = arith.constant dense<0.000000e+00> : vector<8xf32>
    %10 = vector.multi_reduction <add>, %1, %cst [1] : vector<8x32xf32> to vector<8xf32>
    %11 = vector.shape_cast %10 : vector<8xf32> to vector<8x1xf32>
    %cst_5 = arith.constant 3.200000e+01 : f32
    %12 = vector.broadcast %cst_5 : f32 to vector<8x1xf32>
    %13 = arith.divf %11, %12 : vector<8x1xf32>
    %14 = vector.broadcast %13 : vector<8x1xf32> to vector<8x32xf32>
    %15 = arith.subf %1, %14 : vector<8x32xf32>
    %16 = vector.broadcast %13 : vector<8x1xf32> to vector<8x32xf32>
    %17 = arith.subf %1, %16 : vector<8x32xf32>
    %18 = arith.mulf %15, %17 : vector<8x32xf32>
    %cst_6 = arith.constant dense<0.000000e+00> : vector<8xf32>
    %19 = vector.multi_reduction <add>, %18, %cst_6 [1] : vector<8x32xf32> to vector<8xf32>
    %20 = vector.shape_cast %19 : vector<8xf32> to vector<8x1xf32>
    %cst_7 = arith.constant 3.200000e+01 : f32
    %21 = vector.broadcast %cst_7 : f32 to vector<8x1xf32>
    %22 = arith.divf %20, %21 : vector<8x1xf32>
    %23 = vector.broadcast %13 : vector<8x1xf32> to vector<8x32xf32>
    %24 = arith.subf %1, %23 : vector<8x32xf32>
    %cst_8 = arith.constant 9.99999974E-6 : f32
    %25 = vector.broadcast %cst_8 : f32 to vector<8x1xf32>
    %26 = arith.addf %22, %25 : vector<8x1xf32>
    %27 = math.rsqrt %26 : vector<8x1xf32>
    %28 = vector.broadcast %27 : vector<8x1xf32> to vector<8x32xf32>
    %29 = arith.mulf %24, %28 : vector<8x32xf32>
    %30 = vector.broadcast %4 : vector<1x32xf32> to vector<8x32xf32>
    %31 = arith.mulf %29, %30 : vector<8x32xf32>
    %32 = vector.broadcast %5 : vector<1x32xf32> to vector<8x32xf32>
    %33 = arith.addf %31, %32 : vector<8x32xf32>
    %c0_9 = arith.constant 0 : index
    %c0_10 = arith.constant 0 : index
    %c0_11 = arith.constant 0 : index
    %34 = vector.load %arg3[%c0_9, %c0_10, %c0_11] : memref<2x32x96xf32, #tpu.memory_space<vmem>>, vector<1x32x96xf32>
    %35 = vector.shape_cast %34 : vector<1x32x96xf32> to vector<32x96xf32>
    %cst_12 = arith.constant dense<0.000000e+00> : vector<8x96xf32>
    %36 = tpu.matmul %33, %35, %cst_12 {dimension_numbers = #tpu.dot_dimension_numbers<[1], [0], [0], [1], [0, 0, 1, 1], [], []>} : vector<8x32xf32>, vector<32x96xf32>, vector<8x96xf32> -> vector<8x96xf32>
    %c0_13 = arith.constant 0 : index
    %c0_14 = arith.constant 0 : index
    %c0_15 = arith.constant 0 : index
    %37 = vector.load %arg4[%c0_13, %c0_14, %c0_15] : memref<2x32x32xf32, #tpu.memory_space<vmem>>, vector<1x32x32xf32>
    %38 = vector.shape_cast %37 : vector<1x32x32xf32> to vector<32x32xf32>
    %39 = vector.extract_strided_slice %36 {offsets = [0, 0], sizes = [8, 8], strides = [1, 1]} : vector<8x96xf32> to vector<8x8xf32>
    %40 = vector.extract_strided_slice %36 {offsets = [0, 8], sizes = [8, 8], strides = [1, 1]} : vector<8x96xf32> to vector<8x8xf32>
    %41 = vector.extract_strided_slice %36 {offsets = [0, 16], sizes = [8, 8], strides = [1, 1]} : vector<8x96xf32> to vector<8x8xf32>
    %cst_16 = arith.constant dense<0.000000e+00> : vector<8x8xf32>
    %42 = tpu.matmul %39, %40, %cst_16 {dimension_numbers = #tpu.dot_dimension_numbers<[1], [1], [0], [0], [0, 0, 1, 0], [], []>} : vector<8x8xf32>, vector<8x8xf32>, vector<8x8xf32> -> vector<8x8xf32>
    %cst_17 = arith.constant dense<0xFF800000> : vector<8xf32>
    %43 = vector.multi_reduction <maximumf>, %42, %cst_17 [1] : vector<8x8xf32> to vector<8xf32>
    %44 = vector.shape_cast %43 : vector<8xf32> to vector<8x1xf32>
    %45 = vector.broadcast %44 : vector<8x1xf32> to vector<8x8xf32>
    %46 = arith.subf %42, %45 : vector<8x8xf32>
    %47 = math.exp %46 : vector<8x8xf32>
    %cst_18 = arith.constant dense<0.000000e+00> : vector<8xf32>
    %48 = vector.multi_reduction <add>, %47, %cst_18 [1] : vector<8x8xf32> to vector<8xf32>
    %49 = vector.shape_cast %48 : vector<8xf32> to vector<8x1xf32>
    %50 = tpu.reciprocal %49 {approx = true} : vector<8x1xf32> -> vector<8x1xf32>
    %51 = vector.broadcast %50 : vector<8x1xf32> to vector<8x8xf32>
    %52 = arith.mulf %47, %51 : vector<8x8xf32>
    %cst_19 = arith.constant dense<0.000000e+00> : vector<8x8xf32>
    %53 = tpu.matmul %52, %41, %cst_19 {dimension_numbers = #tpu.dot_dimension_numbers<[1], [0], [0], [1], [0, 0, 1, 1], [], []>} : vector<8x8xf32>, vector<8x8xf32>, vector<8x8xf32> -> vector<8x8xf32>
    %54 = vector.extract_strided_slice %38 {offsets = [0, 0], sizes = [8, 32], strides = [1, 1]} : vector<32x32xf32> to vector<8x32xf32>
    %cst_20 = arith.constant dense<0.000000e+00> : vector<8x32xf32>
    %55 = tpu.matmul %53, %54, %cst_20 {dimension_numbers = #tpu.dot_dimension_numbers<[1], [0], [0], [1], [0, 0, 1, 1], [], []>} : vector<8x8xf32>, vector<8x32xf32>, vector<8x32xf32> -> vector<8x32xf32>
    %56 = vector.extract_strided_slice %36 {offsets = [0, 24], sizes = [8, 8], strides = [1, 1]} : vector<8x96xf32> to vector<8x8xf32>
    %57 = vector.extract_strided_slice %36 {offsets = [0, 32], sizes = [8, 8], strides = [1, 1]} : vector<8x96xf32> to vector<8x8xf32>
    %58 = vector.extract_strided_slice %36 {offsets = [0, 40], sizes = [8, 8], strides = [1, 1]} : vector<8x96xf32> to vector<8x8xf32>
    %cst_21 = arith.constant dense<0.000000e+00> : vector<8x8xf32>
    %59 = tpu.matmul %56, %57, %cst_21 {dimension_numbers = #tpu.dot_dimension_numbers<[1], [1], [0], [0], [0, 0, 1, 0], [], []>} : vector<8x8xf32>, vector<8x8xf32>, vector<8x8xf32> -> vector<8x8xf32>
    %cst_22 = arith.constant dense<0xFF800000> : vector<8xf32>
    %60 = vector.multi_reduction <maximumf>, %59, %cst_22 [1] : vector<8x8xf32> to vector<8xf32>
    %61 = vector.shape_cast %60 : vector<8xf32> to vector<8x1xf32>
    %62 = vector.broadcast %61 : vector<8x1xf32> to vector<8x8xf32>
    %63 = arith.subf %59, %62 : vector<8x8xf32>
    %64 = math.exp %63 : vector<8x8xf32>
    %cst_23 = arith.constant dense<0.000000e+00> : vector<8xf32>
    %65 = vector.multi_reduction <add>, %64, %cst_23 [1] : vector<8x8xf32> to vector<8xf32>
    %66 = vector.shape_cast %65 : vector<8xf32> to vector<8x1xf32>
    %67 = tpu.reciprocal %66 {approx = true} : vector<8x1xf32> -> vector<8x1xf32>
    %68 = vector.broadcast %67 : vector<8x1xf32> to vector<8x8xf32>
    %69 = arith.mulf %64, %68 : vector<8x8xf32>
    %cst_24 = arith.constant dense<0.000000e+00> : vector<8x8xf32>
    %70 = tpu.matmul %69, %58, %cst_24 {dimension_numbers = #tpu.dot_dimension_numbers<[1], [0], [0], [1], [0, 0, 1, 1], [], []>} : vector<8x8xf32>, vector<8x8xf32>, vector<8x8xf32> -> vector<8x8xf32>
    %71 = vector.extract_strided_slice %38 {offsets = [8, 0], sizes = [8, 32], strides = [1, 1]} : vector<32x32xf32> to vector<8x32xf32>
    %cst_25 = arith.constant dense<0.000000e+00> : vector<8x32xf32>
    %72 = tpu.matmul %70, %71, %cst_25 {dimension_numbers = #tpu.dot_dimension_numbers<[1], [0], [0], [1], [0, 0, 1, 1], [], []>} : vector<8x8xf32>, vector<8x32xf32>, vector<8x32xf32> -> vector<8x32xf32>
    %73 = arith.addf %55, %72 : vector<8x32xf32>
    %74 = vector.extract_strided_slice %36 {offsets = [0, 48], sizes = [8, 8], strides = [1, 1]} : vector<8x96xf32> to vector<8x8xf32>
    %75 = vector.extract_strided_slice %36 {offsets = [0, 56], sizes = [8, 8], strides = [1, 1]} : vector<8x96xf32> to vector<8x8xf32>
    %76 = vector.extract_strided_slice %36 {offsets = [0, 64], sizes = [8, 8], strides = [1, 1]} : vector<8x96xf32> to vector<8x8xf32>
    %cst_26 = arith.constant dense<0.000000e+00> : vector<8x8xf32>
    %77 = tpu.matmul %74, %75, %cst_26 {dimension_numbers = #tpu.dot_dimension_numbers<[1], [1], [0], [0], [0, 0, 1, 0], [], []>} : vector<8x8xf32>, vector<8x8xf32>, vector<8x8xf32> -> vector<8x8xf32>
    %cst_27 = arith.constant dense<0xFF800000> : vector<8xf32>
    %78 = vector.multi_reduction <maximumf>, %77, %cst_27 [1] : vector<8x8xf32> to vector<8xf32>
    %79 = vector.shape_cast %78 : vector<8xf32> to vector<8x1xf32>
    %80 = vector.broadcast %79 : vector<8x1xf32> to vector<8x8xf32>
    %81 = arith.subf %77, %80 : vector<8x8xf32>
    %82 = math.exp %81 : vector<8x8xf32>
    %cst_28 = arith.constant dense<0.000000e+00> : vector<8xf32>
    %83 = vector.multi_reduction <add>, %82, %cst_28 [1] : vector<8x8xf32> to vector<8xf32>
    %84 = vector.shape_cast %83 : vector<8xf32> to vector<8x1xf32>
    %85 = tpu.reciprocal %84 {approx = true} : vector<8x1xf32> -> vector<8x1xf32>
    %86 = vector.broadcast %85 : vector<8x1xf32> to vector<8x8xf32>
    %87 = arith.mulf %82, %86 : vector<8x8xf32>
    %cst_29 = arith.constant dense<0.000000e+00> : vector<8x8xf32>
    %88 = tpu.matmul %87, %76, %cst_29 {dimension_numbers = #tpu.dot_dimension_numbers<[1], [0], [0], [1], [0, 0, 1, 1], [], []>} : vector<8x8xf32>, vector<8x8xf32>, vector<8x8xf32> -> vector<8x8xf32>
    %89 = vector.extract_strided_slice %38 {offsets = [16, 0], sizes = [8, 32], strides = [1, 1]} : vector<32x32xf32> to vector<8x32xf32>
    %cst_30 = arith.constant dense<0.000000e+00> : vector<8x32xf32>
    %90 = tpu.matmul %88, %89, %cst_30 {dimension_numbers = #tpu.dot_dimension_numbers<[1], [0], [0], [1], [0, 0, 1, 1], [], []>} : vector<8x8xf32>, vector<8x32xf32>, vector<8x32xf32> -> vector<8x32xf32>
    %91 = arith.addf %73, %90 : vector<8x32xf32>
    %92 = vector.extract_strided_slice %36 {offsets = [0, 72], sizes = [8, 8], strides = [1, 1]} : vector<8x96xf32> to vector<8x8xf32>
    %93 = vector.extract_strided_slice %36 {offsets = [0, 80], sizes = [8, 8], strides = [1, 1]} : vector<8x96xf32> to vector<8x8xf32>
    %94 = vector.extract_strided_slice %36 {offsets = [0, 88], sizes = [8, 8], strides = [1, 1]} : vector<8x96xf32> to vector<8x8xf32>
    %cst_31 = arith.constant dense<0.000000e+00> : vector<8x8xf32>
    %95 = tpu.matmul %92, %93, %cst_31 {dimension_numbers = #tpu.dot_dimension_numbers<[1], [1], [0], [0], [0, 0, 1, 0], [], []>} : vector<8x8xf32>, vector<8x8xf32>, vector<8x8xf32> -> vector<8x8xf32>
    %cst_32 = arith.constant dense<0xFF800000> : vector<8xf32>
    %96 = vector.multi_reduction <maximumf>, %95, %cst_32 [1] : vector<8x8xf32> to vector<8xf32>
    %97 = vector.shape_cast %96 : vector<8xf32> to vector<8x1xf32>
    %98 = vector.broadcast %97 : vector<8x1xf32> to vector<8x8xf32>
    %99 = arith.subf %95, %98 : vector<8x8xf32>
    %100 = math.exp %99 : vector<8x8xf32>
    %cst_33 = arith.constant dense<0.000000e+00> : vector<8xf32>
    %101 = vector.multi_reduction <add>, %100, %cst_33 [1] : vector<8x8xf32> to vector<8xf32>
    %102 = vector.shape_cast %101 : vector<8xf32> to vector<8x1xf32>
    %103 = tpu.reciprocal %102 {approx = true} : vector<8x1xf32> -> vector<8x1xf32>
    %104 = vector.broadcast %103 : vector<8x1xf32> to vector<8x8xf32>
    %105 = arith.mulf %100, %104 : vector<8x8xf32>
    %cst_34 = arith.constant dense<0.000000e+00> : vector<8x8xf32>
    %106 = tpu.matmul %105, %94, %cst_34 {dimension_numbers = #tpu.dot_dimension_numbers<[1], [0], [0], [1], [0, 0, 1, 1], [], []>} : vector<8x8xf32>, vector<8x8xf32>, vector<8x8xf32> -> vector<8x8xf32>
    %107 = vector.extract_strided_slice %38 {offsets = [24, 0], sizes = [8, 32], strides = [1, 1]} : vector<32x32xf32> to vector<8x32xf32>
    %cst_35 = arith.constant dense<0.000000e+00> : vector<8x32xf32>
    %108 = tpu.matmul %106, %107, %cst_35 {dimension_numbers = #tpu.dot_dimension_numbers<[1], [0], [0], [1], [0, 0, 1, 1], [], []>} : vector<8x8xf32>, vector<8x32xf32>, vector<8x32xf32> -> vector<8x32xf32>
    %109 = arith.addf %91, %108 : vector<8x32xf32>
    %110 = arith.addf %1, %109 : vector<8x32xf32>
    %111 = vector.broadcast %6 : vector<1x32xf32> to vector<8x32xf32>
    %112 = arith.addf %110, %111 : vector<8x32xf32>
    %cst_36 = arith.constant dense<0.000000e+00> : vector<8xf32>
    %113 = vector.multi_reduction <add>, %112, %cst_36 [1] : vector<8x32xf32> to vector<8xf32>
    %114 = vector.shape_cast %113 : vector<8xf32> to vector<8x1xf32>
    %cst_37 = arith.constant 3.200000e+01 : f32
    %115 = vector.broadcast %cst_37 : f32 to vector<8x1xf32>
    %116 = arith.divf %114, %115 : vector<8x1xf32>
    %117 = vector.broadcast %116 : vector<8x1xf32> to vector<8x32xf32>
    %118 = arith.subf %112, %117 : vector<8x32xf32>
    %119 = vector.broadcast %116 : vector<8x1xf32> to vector<8x32xf32>
    %120 = arith.subf %112, %119 : vector<8x32xf32>
    %121 = arith.mulf %118, %120 : vector<8x32xf32>
    %cst_38 = arith.constant dense<0.000000e+00> : vector<8xf32>
    %122 = vector.multi_reduction <add>, %121, %cst_38 [1] : vector<8x32xf32> to vector<8xf32>
    %123 = vector.shape_cast %122 : vector<8xf32> to vector<8x1xf32>
    %cst_39 = arith.constant 3.200000e+01 : f32
    %124 = vector.broadcast %cst_39 : f32 to vector<8x1xf32>
    %125 = arith.divf %123, %124 : vector<8x1xf32>
    %126 = vector.broadcast %116 : vector<8x1xf32> to vector<8x32xf32>
    %127 = arith.subf %112, %126 : vector<8x32xf32>
    %cst_40 = arith.constant 9.99999974E-6 : f32
    %128 = vector.broadcast %cst_40 : f32 to vector<8x1xf32>
    %129 = arith.addf %125, %128 : vector<8x1xf32>
    %130 = math.rsqrt %129 : vector<8x1xf32>
    %131 = vector.broadcast %130 : vector<8x1xf32> to vector<8x32xf32>
    %132 = arith.mulf %127, %131 : vector<8x32xf32>
    %133 = vector.broadcast %7 : vector<1x32xf32> to vector<8x32xf32>
    %134 = arith.mulf %132, %133 : vector<8x32xf32>
    %135 = vector.broadcast %8 : vector<1x32xf32> to vector<8x32xf32>
    %136 = arith.addf %134, %135 : vector<8x32xf32>
    %c0_41 = arith.constant 0 : index
    %c0_42 = arith.constant 0 : index
    %c0_43 = arith.constant 0 : index
    %137 = vector.load %arg5[%c0_41, %c0_42, %c0_43] : memref<2x32x64xf32, #tpu.memory_space<vmem>>, vector<1x32x64xf32>
    %138 = vector.shape_cast %137 : vector<1x32x64xf32> to vector<32x64xf32>
    %cst_44 = arith.constant dense<0.000000e+00> : vector<8x64xf32>
    %139 = tpu.matmul %136, %138, %cst_44 {dimension_numbers = #tpu.dot_dimension_numbers<[1], [0], [0], [1], [0, 0, 1, 1], [], []>} : vector<8x32xf32>, vector<32x64xf32>, vector<8x64xf32> -> vector<8x64xf32>
    %c0_45 = arith.constant 0 : index
    %c0_46 = arith.constant 0 : index
    %c0_47 = arith.constant 0 : index
    %140 = vector.load %arg6[%c0_45, %c0_46, %c0_47] : memref<2x1x64xf32, #tpu.memory_space<vmem>>, vector<1x1x64xf32>
    %141 = vector.shape_cast %140 : vector<1x1x64xf32> to vector<1x64xf32>
    %142 = vector.broadcast %141 : vector<1x64xf32> to vector<8x64xf32>
    %143 = arith.addf %139, %142 : vector<8x64xf32>
    %cst_48 = arith.constant 5.000000e-01 : f32
    %144 = vector.broadcast %cst_48 : f32 to vector<8x64xf32>
    %145 = arith.mulf %144, %143 : vector<8x64xf32>
    %cst_49 = arith.constant 0.707106769 : f32
    %146 = vector.broadcast %cst_49 : f32 to vector<8x64xf32>
    %147 = arith.mulf %143, %146 : vector<8x64xf32>
    %148 = math.erf %147 : vector<8x64xf32>
    %cst_50 = arith.constant 1.000000e+00 : f32
    %149 = vector.broadcast %cst_50 : f32 to vector<8x64xf32>
    %150 = arith.addf %149, %148 : vector<8x64xf32>
    %151 = arith.mulf %145, %150 : vector<8x64xf32>
    %c0_51 = arith.constant 0 : index
    %c0_52 = arith.constant 0 : index
    %c0_53 = arith.constant 0 : index
    %152 = vector.load %arg7[%c0_51, %c0_52, %c0_53] : memref<2x64x32xf32, #tpu.memory_space<vmem>>, vector<1x64x32xf32>
    %153 = vector.shape_cast %152 : vector<1x64x32xf32> to vector<64x32xf32>
    %cst_54 = arith.constant dense<0.000000e+00> : vector<8x32xf32>
    %154 = tpu.matmul %151, %153, %cst_54 {dimension_numbers = #tpu.dot_dimension_numbers<[1], [0], [0], [1], [0, 0, 1, 1], [], []>} : vector<8x64xf32>, vector<64x32xf32>, vector<8x32xf32> -> vector<8x32xf32>
    %155 = arith.addf %112, %154 : vector<8x32xf32>
    %156 = vector.broadcast %9 : vector<1x32xf32> to vector<8x32xf32>
    %157 = arith.addf %155, %156 : vector<8x32xf32>
    %c1 = arith.constant 1 : index
    %c0_55 = arith.constant 0 : index
    %c0_56 = arith.constant 0 : index
    %158 = vector.load %arg2[%c1, %c0_55, %c0_56] : memref<2x6x32xf32, #tpu.memory_space<vmem>>, vector<1x6x32xf32>
    %159 = vector.shape_cast %158 : vector<1x6x32xf32> to vector<6x32xf32>
    %160 = vector.extract_strided_slice %159 {offsets = [0, 0], sizes = [1, 32], strides = [1, 1]} : vector<6x32xf32> to vector<1x32xf32>
    %161 = vector.extract_strided_slice %159 {offsets = [1, 0], sizes = [1, 32], strides = [1, 1]} : vector<6x32xf32> to vector<1x32xf32>
    %162 = vector.extract_strided_slice %159 {offsets = [2, 0], sizes = [1, 32], strides = [1, 1]} : vector<6x32xf32> to vector<1x32xf32>
    %163 = vector.extract_strided_slice %159 {offsets = [3, 0], sizes = [1, 32], strides = [1, 1]} : vector<6x32xf32> to vector<1x32xf32>
    %164 = vector.extract_strided_slice %159 {offsets = [4, 0], sizes = [1, 32], strides = [1, 1]} : vector<6x32xf32> to vector<1x32xf32>
    %165 = vector.extract_strided_slice %159 {offsets = [5, 0], sizes = [1, 32], strides = [1, 1]} : vector<6x32xf32> to vector<1x32xf32>
    %cst_57 = arith.constant dense<0.000000e+00> : vector<8xf32>
    %166 = vector.multi_reduction <add>, %157, %cst_57 [1] : vector<8x32xf32> to vector<8xf32>
    %167 = vector.shape_cast %166 : vector<8xf32> to vector<8x1xf32>
    %cst_58 = arith.constant 3.200000e+01 : f32
    %168 = vector.broadcast %cst_58 : f32 to vector<8x1xf32>
    %169 = arith.divf %167, %168 : vector<8x1xf32>
    %170 = vector.broadcast %169 : vector<8x1xf32> to vector<8x32xf32>
    %171 = arith.subf %157, %170 : vector<8x32xf32>
    %172 = vector.broadcast %169 : vector<8x1xf32> to vector<8x32xf32>
    %173 = arith.subf %157, %172 : vector<8x32xf32>
    %174 = arith.mulf %171, %173 : vector<8x32xf32>
    %cst_59 = arith.constant dense<0.000000e+00> : vector<8xf32>
    %175 = vector.multi_reduction <add>, %174, %cst_59 [1] : vector<8x32xf32> to vector<8xf32>
    %176 = vector.shape_cast %175 : vector<8xf32> to vector<8x1xf32>
    %cst_60 = arith.constant 3.200000e+01 : f32
    %177 = vector.broadcast %cst_60 : f32 to vector<8x1xf32>
    %178 = arith.divf %176, %177 : vector<8x1xf32>
    %179 = vector.broadcast %169 : vector<8x1xf32> to vector<8x32xf32>
    %180 = arith.subf %157, %179 : vector<8x32xf32>
    %cst_61 = arith.constant 9.99999974E-6 : f32
    %181 = vector.broadcast %cst_61 : f32 to vector<8x1xf32>
    %182 = arith.addf %178, %181 : vector<8x1xf32>
    %183 = math.rsqrt %182 : vector<8x1xf32>
    %184 = vector.broadcast %183 : vector<8x1xf32> to vector<8x32xf32>
    %185 = arith.mulf %180, %184 : vector<8x32xf32>
    %186 = vector.broadcast %160 : vector<1x32xf32> to vector<8x32xf32>
    %187 = arith.mulf %185, %186 : vector<8x32xf32>
    %188 = vector.broadcast %161 : vector<1x32xf32> to vector<8x32xf32>
    %189 = arith.addf %187, %188 : vector<8x32xf32>
    %c1_62 = arith.constant 1 : index
    %c0_63 = arith.constant 0 : index
    %c0_64 = arith.constant 0 : index
    %190 = vector.load %arg3[%c1_62, %c0_63, %c0_64] : memref<2x32x96xf32, #tpu.memory_space<vmem>>, vector<1x32x96xf32>
    %191 = vector.shape_cast %190 : vector<1x32x96xf32> to vector<32x96xf32>
    %cst_65 = arith.constant dense<0.000000e+00> : vector<8x96xf32>
    %192 = tpu.matmul %189, %191, %cst_65 {dimension_numbers = #tpu.dot_dimension_numbers<[1], [0], [0], [1], [0, 0, 1, 1], [], []>} : vector<8x32xf32>, vector<32x96xf32>, vector<8x96xf32> -> vector<8x96xf32>
    %c1_66 = arith.constant 1 : index
    %c0_67 = arith.constant 0 : index
    %c0_68 = arith.constant 0 : index
    %193 = vector.load %arg4[%c1_66, %c0_67, %c0_68] : memref<2x32x32xf32, #tpu.memory_space<vmem>>, vector<1x32x32xf32>
    %194 = vector.shape_cast %193 : vector<1x32x32xf32> to vector<32x32xf32>
    %195 = vector.extract_strided_slice %192 {offsets = [0, 0], sizes = [8, 8], strides = [1, 1]} : vector<8x96xf32> to vector<8x8xf32>
    %196 = vector.extract_strided_slice %192 {offsets = [0, 8], sizes = [8, 8], strides = [1, 1]} : vector<8x96xf32> to vector<8x8xf32>
    %197 = vector.extract_strided_slice %192 {offsets = [0, 16], sizes = [8, 8], strides = [1, 1]} : vector<8x96xf32> to vector<8x8xf32>
    %cst_69 = arith.constant dense<0.000000e+00> : vector<8x8xf32>
    %198 = tpu.matmul %195, %196, %cst_69 {dimension_numbers = #tpu.dot_dimension_numbers<[1], [1], [0], [0], [0, 0, 1, 0], [], []>} : vector<8x8xf32>, vector<8x8xf32>, vector<8x8xf32> -> vector<8x8xf32>
    %cst_70 = arith.constant dense<0xFF800000> : vector<8xf32>
    %199 = vector.multi_reduction <maximumf>, %198, %cst_70 [1] : vector<8x8xf32> to vector<8xf32>
    %200 = vector.shape_cast %199 : vector<8xf32> to vector<8x1xf32>
    %201 = vector.broadcast %200 : vector<8x1xf32> to vector<8x8xf32>
    %202 = arith.subf %198, %201 : vector<8x8xf32>
    %203 = math.exp %202 : vector<8x8xf32>
    %cst_71 = arith.constant dense<0.000000e+00> : vector<8xf32>
    %204 = vector.multi_reduction <add>, %203, %cst_71 [1] : vector<8x8xf32> to vector<8xf32>
    %205 = vector.shape_cast %204 : vector<8xf32> to vector<8x1xf32>
    %206 = tpu.reciprocal %205 {approx = true} : vector<8x1xf32> -> vector<8x1xf32>
    %207 = vector.broadcast %206 : vector<8x1xf32> to vector<8x8xf32>
    %208 = arith.mulf %203, %207 : vector<8x8xf32>
    %cst_72 = arith.constant dense<0.000000e+00> : vector<8x8xf32>
    %209 = tpu.matmul %208, %197, %cst_72 {dimension_numbers = #tpu.dot_dimension_numbers<[1], [0], [0], [1], [0, 0, 1, 1], [], []>} : vector<8x8xf32>, vector<8x8xf32>, vector<8x8xf32> -> vector<8x8xf32>
    %210 = vector.extract_strided_slice %194 {offsets = [0, 0], sizes = [8, 32], strides = [1, 1]} : vector<32x32xf32> to vector<8x32xf32>
    %cst_73 = arith.constant dense<0.000000e+00> : vector<8x32xf32>
    %211 = tpu.matmul %209, %210, %cst_73 {dimension_numbers = #tpu.dot_dimension_numbers<[1], [0], [0], [1], [0, 0, 1, 1], [], []>} : vector<8x8xf32>, vector<8x32xf32>, vector<8x32xf32> -> vector<8x32xf32>
    %212 = vector.extract_strided_slice %192 {offsets = [0, 24], sizes = [8, 8], strides = [1, 1]} : vector<8x96xf32> to vector<8x8xf32>
    %213 = vector.extract_strided_slice %192 {offsets = [0, 32], sizes = [8, 8], strides = [1, 1]} : vector<8x96xf32> to vector<8x8xf32>
    %214 = vector.extract_strided_slice %192 {offsets = [0, 40], sizes = [8, 8], strides = [1, 1]} : vector<8x96xf32> to vector<8x8xf32>
    %cst_74 = arith.constant dense<0.000000e+00> : vector<8x8xf32>
    %215 = tpu.matmul %212, %213, %cst_74 {dimension_numbers = #tpu.dot_dimension_numbers<[1], [1], [0], [0], [0, 0, 1, 0], [], []>} : vector<8x8xf32>, vector<8x8xf32>, vector<8x8xf32> -> vector<8x8xf32>
    %cst_75 = arith.constant dense<0xFF800000> : vector<8xf32>
    %216 = vector.multi_reduction <maximumf>, %215, %cst_75 [1] : vector<8x8xf32> to vector<8xf32>
    %217 = vector.shape_cast %216 : vector<8xf32> to vector<8x1xf32>
    %218 = vector.broadcast %217 : vector<8x1xf32> to vector<8x8xf32>
    %219 = arith.subf %215, %218 : vector<8x8xf32>
    %220 = math.exp %219 : vector<8x8xf32>
    %cst_76 = arith.constant dense<0.000000e+00> : vector<8xf32>
    %221 = vector.multi_reduction <add>, %220, %cst_76 [1] : vector<8x8xf32> to vector<8xf32>
    %222 = vector.shape_cast %221 : vector<8xf32> to vector<8x1xf32>
    %223 = tpu.reciprocal %222 {approx = true} : vector<8x1xf32> -> vector<8x1xf32>
    %224 = vector.broadcast %223 : vector<8x1xf32> to vector<8x8xf32>
    %225 = arith.mulf %220, %224 : vector<8x8xf32>
    %cst_77 = arith.constant dense<0.000000e+00> : vector<8x8xf32>
    %226 = tpu.matmul %225, %214, %cst_77 {dimension_numbers = #tpu.dot_dimension_numbers<[1], [0], [0], [1], [0, 0, 1, 1], [], []>} : vector<8x8xf32>, vector<8x8xf32>, vector<8x8xf32> -> vector<8x8xf32>
    %227 = vector.extract_strided_slice %194 {offsets = [8, 0], sizes = [8, 32], strides = [1, 1]} : vector<32x32xf32> to vector<8x32xf32>
    %cst_78 = arith.constant dense<0.000000e+00> : vector<8x32xf32>
    %228 = tpu.matmul %226, %227, %cst_78 {dimension_numbers = #tpu.dot_dimension_numbers<[1], [0], [0], [1], [0, 0, 1, 1], [], []>} : vector<8x8xf32>, vector<8x32xf32>, vector<8x32xf32> -> vector<8x32xf32>
    %229 = arith.addf %211, %228 : vector<8x32xf32>
    %230 = vector.extract_strided_slice %192 {offsets = [0, 48], sizes = [8, 8], strides = [1, 1]} : vector<8x96xf32> to vector<8x8xf32>
    %231 = vector.extract_strided_slice %192 {offsets = [0, 56], sizes = [8, 8], strides = [1, 1]} : vector<8x96xf32> to vector<8x8xf32>
    %232 = vector.extract_strided_slice %192 {offsets = [0, 64], sizes = [8, 8], strides = [1, 1]} : vector<8x96xf32> to vector<8x8xf32>
    %cst_79 = arith.constant dense<0.000000e+00> : vector<8x8xf32>
    %233 = tpu.matmul %230, %231, %cst_79 {dimension_numbers = #tpu.dot_dimension_numbers<[1], [1], [0], [0], [0, 0, 1, 0], [], []>} : vector<8x8xf32>, vector<8x8xf32>, vector<8x8xf32> -> vector<8x8xf32>
    %cst_80 = arith.constant dense<0xFF800000> : vector<8xf32>
    %234 = vector.multi_reduction <maximumf>, %233, %cst_80 [1] : vector<8x8xf32> to vector<8xf32>
    %235 = vector.shape_cast %234 : vector<8xf32> to vector<8x1xf32>
    %236 = vector.broadcast %235 : vector<8x1xf32> to vector<8x8xf32>
    %237 = arith.subf %233, %236 : vector<8x8xf32>
    %238 = math.exp %237 : vector<8x8xf32>
    %cst_81 = arith.constant dense<0.000000e+00> : vector<8xf32>
    %239 = vector.multi_reduction <add>, %238, %cst_81 [1] : vector<8x8xf32> to vector<8xf32>
    %240 = vector.shape_cast %239 : vector<8xf32> to vector<8x1xf32>
    %241 = tpu.reciprocal %240 {approx = true} : vector<8x1xf32> -> vector<8x1xf32>
    %242 = vector.broadcast %241 : vector<8x1xf32> to vector<8x8xf32>
    %243 = arith.mulf %238, %242 : vector<8x8xf32>
    %cst_82 = arith.constant dense<0.000000e+00> : vector<8x8xf32>
    %244 = tpu.matmul %243, %232, %cst_82 {dimension_numbers = #tpu.dot_dimension_numbers<[1], [0], [0], [1], [0, 0, 1, 1], [], []>} : vector<8x8xf32>, vector<8x8xf32>, vector<8x8xf32> -> vector<8x8xf32>
    %245 = vector.extract_strided_slice %194 {offsets = [16, 0], sizes = [8, 32], strides = [1, 1]} : vector<32x32xf32> to vector<8x32xf32>
    %cst_83 = arith.constant dense<0.000000e+00> : vector<8x32xf32>
    %246 = tpu.matmul %244, %245, %cst_83 {dimension_numbers = #tpu.dot_dimension_numbers<[1], [0], [0], [1], [0, 0, 1, 1], [], []>} : vector<8x8xf32>, vector<8x32xf32>, vector<8x32xf32> -> vector<8x32xf32>
    %247 = arith.addf %229, %246 : vector<8x32xf32>
    %248 = vector.extract_strided_slice %192 {offsets = [0, 72], sizes = [8, 8], strides = [1, 1]} : vector<8x96xf32> to vector<8x8xf32>
    %249 = vector.extract_strided_slice %192 {offsets = [0, 80], sizes = [8, 8], strides = [1, 1]} : vector<8x96xf32> to vector<8x8xf32>
    %250 = vector.extract_strided_slice %192 {offsets = [0, 88], sizes = [8, 8], strides = [1, 1]} : vector<8x96xf32> to vector<8x8xf32>
    %cst_84 = arith.constant dense<0.000000e+00> : vector<8x8xf32>
    %251 = tpu.matmul %248, %249, %cst_84 {dimension_numbers = #tpu.dot_dimension_numbers<[1], [1], [0], [0], [0, 0, 1, 0], [], []>} : vector<8x8xf32>, vector<8x8xf32>, vector<8x8xf32> -> vector<8x8xf32>
    %cst_85 = arith.constant dense<0xFF800000> : vector<8xf32>
    %252 = vector.multi_reduction <maximumf>, %251, %cst_85 [1] : vector<8x8xf32> to vector<8xf32>
    %253 = vector.shape_cast %252 : vector<8xf32> to vector<8x1xf32>
    %254 = vector.broadcast %253 : vector<8x1xf32> to vector<8x8xf32>
    %255 = arith.subf %251, %254 : vector<8x8xf32>
    %256 = math.exp %255 : vector<8x8xf32>
    %cst_86 = arith.constant dense<0.000000e+00> : vector<8xf32>
    %257 = vector.multi_reduction <add>, %256, %cst_86 [1] : vector<8x8xf32> to vector<8xf32>
    %258 = vector.shape_cast %257 : vector<8xf32> to vector<8x1xf32>
    %259 = tpu.reciprocal %258 {approx = true} : vector<8x1xf32> -> vector<8x1xf32>
    %260 = vector.broadcast %259 : vector<8x1xf32> to vector<8x8xf32>
    %261 = arith.mulf %256, %260 : vector<8x8xf32>
    %cst_87 = arith.constant dense<0.000000e+00> : vector<8x8xf32>
    %262 = tpu.matmul %261, %250, %cst_87 {dimension_numbers = #tpu.dot_dimension_numbers<[1], [0], [0], [1], [0, 0, 1, 1], [], []>} : vector<8x8xf32>, vector<8x8xf32>, vector<8x8xf32> -> vector<8x8xf32>
    %263 = vector.extract_strided_slice %194 {offsets = [24, 0], sizes = [8, 32], strides = [1, 1]} : vector<32x32xf32> to vector<8x32xf32>
    %cst_88 = arith.constant dense<0.000000e+00> : vector<8x32xf32>
    %264 = tpu.matmul %262, %263, %cst_88 {dimension_numbers = #tpu.dot_dimension_numbers<[1], [0], [0], [1], [0, 0, 1, 1], [], []>} : vector<8x8xf32>, vector<8x32xf32>, vector<8x32xf32> -> vector<8x32xf32>
    %265 = arith.addf %247, %264 : vector<8x32xf32>
    %266 = arith.addf %157, %265 : vector<8x32xf32>
    %267 = vector.broadcast %162 : vector<1x32xf32> to vector<8x32xf32>
    %268 = arith.addf %266, %267 : vector<8x32xf32>
    %cst_89 = arith.constant dense<0.000000e+00> : vector<8xf32>
    %269 = vector.multi_reduction <add>, %268, %cst_89 [1] : vector<8x32xf32> to vector<8xf32>
    %270 = vector.shape_cast %269 : vector<8xf32> to vector<8x1xf32>
    %cst_90 = arith.constant 3.200000e+01 : f32
    %271 = vector.broadcast %cst_90 : f32 to vector<8x1xf32>
    %272 = arith.divf %270, %271 : vector<8x1xf32>
    %273 = vector.broadcast %272 : vector<8x1xf32> to vector<8x32xf32>
    %274 = arith.subf %268, %273 : vector<8x32xf32>
    %275 = vector.broadcast %272 : vector<8x1xf32> to vector<8x32xf32>
    %276 = arith.subf %268, %275 : vector<8x32xf32>
    %277 = arith.mulf %274, %276 : vector<8x32xf32>
    %cst_91 = arith.constant dense<0.000000e+00> : vector<8xf32>
    %278 = vector.multi_reduction <add>, %277, %cst_91 [1] : vector<8x32xf32> to vector<8xf32>
    %279 = vector.shape_cast %278 : vector<8xf32> to vector<8x1xf32>
    %cst_92 = arith.constant 3.200000e+01 : f32
    %280 = vector.broadcast %cst_92 : f32 to vector<8x1xf32>
    %281 = arith.divf %279, %280 : vector<8x1xf32>
    %282 = vector.broadcast %272 : vector<8x1xf32> to vector<8x32xf32>
    %283 = arith.subf %268, %282 : vector<8x32xf32>
    %cst_93 = arith.constant 9.99999974E-6 : f32
    %284 = vector.broadcast %cst_93 : f32 to vector<8x1xf32>
    %285 = arith.addf %281, %284 : vector<8x1xf32>
    %286 = math.rsqrt %285 : vector<8x1xf32>
    %287 = vector.broadcast %286 : vector<8x1xf32> to vector<8x32xf32>
    %288 = arith.mulf %283, %287 : vector<8x32xf32>
    %289 = vector.broadcast %163 : vector<1x32xf32> to vector<8x32xf32>
    %290 = arith.mulf %288, %289 : vector<8x32xf32>
    %291 = vector.broadcast %164 : vector<1x32xf32> to vector<8x32xf32>
    %292 = arith.addf %290, %291 : vector<8x32xf32>
    %c1_94 = arith.constant 1 : index
    %c0_95 = arith.constant 0 : index
    %c0_96 = arith.constant 0 : index
    %293 = vector.load %arg5[%c1_94, %c0_95, %c0_96] : memref<2x32x64xf32, #tpu.memory_space<vmem>>, vector<1x32x64xf32>
    %294 = vector.shape_cast %293 : vector<1x32x64xf32> to vector<32x64xf32>
    %cst_97 = arith.constant dense<0.000000e+00> : vector<8x64xf32>
    %295 = tpu.matmul %292, %294, %cst_97 {dimension_numbers = #tpu.dot_dimension_numbers<[1], [0], [0], [1], [0, 0, 1, 1], [], []>} : vector<8x32xf32>, vector<32x64xf32>, vector<8x64xf32> -> vector<8x64xf32>
    %c1_98 = arith.constant 1 : index
    %c0_99 = arith.constant 0 : index
    %c0_100 = arith.constant 0 : index
    %296 = vector.load %arg6[%c1_98, %c0_99, %c0_100] : memref<2x1x64xf32, #tpu.memory_space<vmem>>, vector<1x1x64xf32>
    %297 = vector.shape_cast %296 : vector<1x1x64xf32> to vector<1x64xf32>
    %298 = vector.broadcast %297 : vector<1x64xf32> to vector<8x64xf32>
    %299 = arith.addf %295, %298 : vector<8x64xf32>
    %cst_101 = arith.constant 5.000000e-01 : f32
    %300 = vector.broadcast %cst_101 : f32 to vector<8x64xf32>
    %301 = arith.mulf %300, %299 : vector<8x64xf32>
    %cst_102 = arith.constant 0.707106769 : f32
    %302 = vector.broadcast %cst_102 : f32 to vector<8x64xf32>
    %303 = arith.mulf %299, %302 : vector<8x64xf32>
    %304 = math.erf %303 : vector<8x64xf32>
    %cst_103 = arith.constant 1.000000e+00 : f32
    %305 = vector.broadcast %cst_103 : f32 to vector<8x64xf32>
    %306 = arith.addf %305, %304 : vector<8x64xf32>
    %307 = arith.mulf %301, %306 : vector<8x64xf32>
    %c1_104 = arith.constant 1 : index
    %c0_105 = arith.constant 0 : index
    %c0_106 = arith.constant 0 : index
    %308 = vector.load %arg7[%c1_104, %c0_105, %c0_106] : memref<2x64x32xf32, #tpu.memory_space<vmem>>, vector<1x64x32xf32>
    %309 = vector.shape_cast %308 : vector<1x64x32xf32> to vector<64x32xf32>
    %cst_107 = arith.constant dense<0.000000e+00> : vector<8x32xf32>
    %310 = tpu.matmul %307, %309, %cst_107 {dimension_numbers = #tpu.dot_dimension_numbers<[1], [0], [0], [1], [0, 0, 1, 1], [], []>} : vector<8x64xf32>, vector<64x32xf32>, vector<8x32xf32> -> vector<8x32xf32>
    %311 = arith.addf %268, %310 : vector<8x32xf32>
    %312 = vector.broadcast %165 : vector<1x32xf32> to vector<8x32xf32>
    %313 = arith.addf %311, %312 : vector<8x32xf32>
    %c0_108 = arith.constant 0 : index
    %c0_109 = arith.constant 0 : index
    %c0_110 = arith.constant 0 : index
    %314 = vector.load %arg8[%c0_108, %c0_109, %c0_110] : memref<1x8x32xf32, #tpu.memory_space<vmem>>, vector<1x8x32xf32>
    %315 = vector.shape_cast %314 : vector<1x8x32xf32> to vector<8x32xf32>
    %316 = vector.shape_cast %313 : vector<8x32xf32> to vector<1x8x32xf32>
    tpu.vector_store %arg8[%c0_108, %c0_109, %c0_110], %316 {strides = array<i32>} : memref<1x8x32xf32, #tpu.memory_space<vmem>>, vector<1x8x32xf32>,
    return
  }
  func.func @transform_0(%arg0: i32) -> (i32, i32, i32) {
    %c0_i32 = arith.constant 0 : i32
    %c0_i32_0 = arith.constant 0 : i32
    %c0_i32_1 = arith.constant 0 : i32
    return %arg0, %c0_i32, %c0_i32_0 : i32, i32, i32
  }
  func.func @transform_1(%arg0: i32) -> (i32, i32, i32) {
    %c0_i32 = arith.constant 0 : i32
    %c0_i32_0 = arith.constant 0 : i32
    %c0_i32_1 = arith.constant 0 : i32
    %c0_i32_2 = arith.constant 0 : i32
    return %c0_i32, %c0_i32_0, %c0_i32_1 : i32, i32, i32
  }
  func.func @transform_2(%arg0: i32) -> (i32, i32, i32) {
    %c0_i32 = arith.constant 0 : i32
    %c0_i32_0 = arith.constant 0 : i32
    %c0_i32_1 = arith.constant 0 : i32
    %c0_i32_2 = arith.constant 0 : i32
    return %c0_i32, %c0_i32_0, %c0_i32_1 : i32, i32, i32
  }
  func.func @transform_3(%arg0: i32) -> (i32, i32, i32) {
    %c0_i32 = arith.constant 0 : i32
    %c0_i32_0 = arith.constant 0 : i32
    %c0_i32_1 = arith.constant 0 : i32
    %c0_i32_2 = arith.constant 0 : i32
    return %c0_i32, %c0_i32_0, %c0_i32_1 : i32, i32, i32
  }
  func.func @transform_4(%arg0: i32) -> (i32, i32, i32) {
    %c0_i32 = arith.constant 0 : i32
    %c0_i32_0 = arith.constant 0 : i32
    %c0_i32_1 = arith.constant 0 : i32
    %c0_i32_2 = arith.constant 0 : i32
    return %c0_i32, %c0_i32_0, %c0_i32_1 : i32, i32, i32
  }
  func.func @transform_5(%arg0: i32) -> (i32, i32, i32) {
    %c0_i32 = arith.constant 0 : i32
    %c0_i32_0 = arith.constant 0 : i32
    %c0_i32_1 = arith.constant 0 : i32
    %c0_i32_2 = arith.constant 0 : i32
    return %c0_i32, %c0_i32_0, %c0_i32_1 : i32, i32, i32
  }
  func.func @transform_6(%arg0: i32) -> (i32, i32, i32) {
    %c0_i32 = arith.constant 0 : i32
    %c0_i32_0 = arith.constant 0 : i32
    %c0_i32_1 = arith.constant 0 : i32
    %c0_i32_2 = arith.constant 0 : i32
    return %c0_i32, %c0_i32_0, %c0_i32_1 : i32, i32, i32
  }
  func.func @transform_7(%arg0: i32) -> (i32, i32, i32) {
    %c0_i32 = arith.constant 0 : i32
    %c0_i32_0 = arith.constant 0 : i32
    %c0_i32_1 = arith.constant 0 : i32
    return %arg0, %c0_i32, %c0_i32_0 : i32, i32, i32
  }
}

</mosaic_0001>

<bundles_post_ra>
// kernel: tpu_custom_call.1
= control target key start
LH: loop header
LB: loop body
LE: loop exit
PB: predicated region body
PF: predicated region fallthrough
CT: control target
= control target key end

     0   :  { %12 = vsyncpa [#allocation3], 0  ;;  %s3973_s0 = inlined_call_operand.vmem [shape: f32[2,8,32], index: 0, kind: input, shape index: {}]   ;;  %s3974_s1 = inlined_call_operand.vmem [shape: f32[2,6,32], index: 1, kind: input, shape index: {}]   ;;  %s3975_s2 = inlined_call_operand.vmem [shape: f32[2,32,96], index: 2, kind: input, shape index: {}]   ;;  %s3976_s3 = inlined_call_operand.vmem [shape: f32[2,32,32], index: 3, kind: input, shape index: {}]   ;;  %s3977_s4 = inlined_call_operand.vmem [shape: f32[2,32,64], index: 4, kind: input, shape index: {}]   ;;  %s3978_s5 = inlined_call_operand.vmem [shape: f32[2,1,64], index: 5, kind: input, shape index: {}]   ;;  %s3979_s6 = inlined_call_operand.vmem [shape: f32[2,64,32], index: 6, kind: input, shape index: {}]   ;;  %s3980_s7 = inlined_call_operand.hbm [shape: f32[2,8,32], index: 7, kind: output, shape index: {}]  }
   0x1   :  { %14 = vsyncpa [#allocation3 + $0x1], 0  ;;  %s3457_s24 = smov 0   ;;  %s3459_s25 = smov 0  }
   0x2   :  { %s3461_s26 = smov 0   ;;  %s3463_s27 = smov 0  }
   0x3 LB: > { %s3478_s28 = sadd.s32 4294967295, %s3401_s27   ;;  %s2885_s29 = sadd.s32 4294967294, %s3401_s27   ;;  %s3401_s27 = sphi %s3463_s27, %s3996_s27   ;;  %s3397_s26 = sphi %s3461_s26, %s3995_s26   ;;  %s3393_s25 = sphi %s3459_s25, %s3994_s25   ;;  %s3389_s24 = sphi %s3457_s24, %s3993_s24  }
   0x4   : > { %s3482_s30 = sadd.s32 1, %s3401_s27   ;;  %s179_s8 = sadd.s32 1, %s3397_s26 }
   0x5   : > { %s176_s9 = ssub.s32 %s3401_s27, %s3482_s30  ;;  %p189_p0 = scmp.ne.s32.totalorder %s3397_s26, %s3393_s25 }
   0x6   : > { %p177_p1 = scmp.eq.s32.totalorder %s176_s9, 0  ;;  %p190_p2 = scmp.eq.s32.totalorder %s3478_s28, 1 }
   0x7   : > { %p195_p3 = scmp.ne.s32.totalorder %s3393_s25, %s3389_s24  ;;  %p196_p4 = scmp.eq.s32.totalorder %s2885_s29, 1 }
   0x8   : > { %s3493_s10 = scalar_select %p177_p1, %s3397_s26, %s179_s8  }
   0x9   : > { %p3495_p5 = por %p190_p2, %p189_p0  ;;  %p3499_p6 = por %p196_p4, %p195_p3 }
   0xa   : > { %p2888_p7 = scmp.ge.s32.totalorder %s3401_s27, 1  ;;  %p239_p8 = scmp.lt.s32.totalorder %s3401_s27, 3 }
   0xc   : > { %p240_p9 = pnand %p2888_p7, %p239_p8 }
   0xd   : > { %p270_p10 = scmp.lt.s32.totalorder (!%p240_p9), %s3478_s28, 1  ;;  %s3406_s15 = smov (!%p240_p9), 120  }
   0xe   : > { %243 = sbr.rel (%p240_p9) target bundleno = 6939 (0x1b1b), region = 48  ;;  %s3407_s16 = smov (!%p240_p9), 96  }
   0xf   : > { %s3409_s18 = smov (!%p240_p9), 112   ;;  %s3410_s19 = smov (!%p240_p9), 72  }
  0x10   : > { %s3985_s20 = smov (!%p240_p9), 80   ;;  %s3982_s8 = smov (!%p240_p9), 64  }
  0x11   : > { %s3983_s9 = smov (!%p240_p9), 56   ;;  %s3981_s23 = smov (!%p240_p9), 40  }
  0x12   : > { %s3991_s22 = smov (!%p240_p9), 64  }
  0x13   : > { %s271_s13 = scalar_select %p270_p10, %s3478_s28, 1  ;;  %vm276_vm0 = vcmask 261120   ;;  %v304_v7 = vld [vmem:[%s3975_s2 + $0x18] sm:$0xff]  ;;  %v3403_v8 = vmov 0.0   ;;  %v303_v9 = vld [vmem:[%s3975_s2 + $0x10] sm:$0xff]  ;;  %vm3404_vm1 = vmmov 0   ;;  %v291_v15 = vlaneseq }
  0x14   : > { %3043 = vmatprep.subr.mxu0 %v3403_v8  ;;  %3051 = vmatprep.mubr.msk.f32.mxu0 %vm3404_vm1, %v3403_v8  ;;  %v302_v10 = vld [vmem:[%s3975_s2 + $0x8] sm:$0xff]  ;;  %v301_v11 = vld [vmem:[%s3975_s2] sm:$0xff]  ;;  %vm385_vm2 = vcmask 64512   ;;  %vm1462_vm3 = vcmask 523264  }
  0x15   : > { %s2890_s14 = sshll.u32 %s271_s13, 3  ;;  %3044 = vmatpush3.msra.mxu0 %v304_v7  ;;  %3059 = vmatprep.subr.mxu1 %v3403_v8  ;;  %v3538_v16 = vshrl.u32 %v291_v15, 7  ;;  %v3544_v18 = vld [vmem:[%s3974_s1] sm:$0x3f]  ;;  %v379_v56 = vld [vmem:[%s3976_s3 + $0x8] sm:$0xff]  ;;  %s3984_s13 = smov 48  }
  0x16   : > { %s273_s17 = scalar_lea.vmem %s3973_s0, %s2890_s14  ;;  %3045 = vmatprep.subr.mxu0 %v3403_v8  ;;  %3061 = vmatprep.mubr.msk.f32.mxu1 %vm3404_vm1, %v3403_v8  ;;  %s3405_s14 = smov 104   ;;  %v378_v55 = vld [vmem:[%s3976_s3] sm:$0xff] }
  0x17   : > { %v3510_v0 = vld [vmem:[%s273_s17] sm:$0xff]  ;;  %3046 = vmatpush3.msra.mxu0 %v303_v9  ;;  %v293_v17 = vsub.s32 0, %v3538_v16  ;;  %v298_v19 = vsub.s32 1, %v3538_v16  ;;  %s3408_s17 = smov 88  }
  0x18   : > { %v277_v1 = vsel %vm276_vm0, %v3510_v0, 0.0  ;;  %3047 = vmatprep.subr.mxu0 %v3403_v8 }
  0x19   : > { %278 = vadd.xlane.f32.xlu0 %v277_v1  ;;  %3048 = vmatpush3.msra.mxu0 %v302_v10  ;;  %v294_v20 = vrot.slane %v3544_v18, %v293_v17  ;;  %v299_v23 = vrot.slane %v3544_v18, %v298_v19 }
  0x1a   : > { %3049 = vmatprep.subr.mxu0 %v3403_v8 }
  0x1b   : > { %3050 = vmatpush3.msra.mxu0 %v301_v11 }
  0x1c   : > { %3054 = vmatprep.subr.mxu0 %v3403_v8 }
  0xa2   : > { %v279_v2 = vpop.xlane.xlu0 %278 }
  0xa3   : > { %v281_v3 = vmul.f32 0.03125, %v279_v2 }
  0xa5   : > { %v282_v4 = vsub.f32 %v3510_v0, %v281_v3 }
  0xa7   : > { %v283_v5 = vmul.f32 %v282_v4, %v282_v4 }
  0xa9   : > { %v284_v6 = vsel %vm276_vm0, %v283_v5, 0.0 }
  0xaa   : > { %285 = vadd.xlane.f32.xlu0 %v284_v6 }
 0x133   : > { %v286_v12 = vpop.xlane.xlu0 %285 }
 0x134   : > { %v287_v13 = vmul.f32 0.03125, %v286_v12 }
 0x136   : > { %v288_v14 = vadd.f32 1e-05, %v287_v13 }
 0x138   : > { %3297 = vrsqrt.f32 %v288_v14 }
 0x145   : > { %v3298_v21 = vpop.eup %3297 }
 0x146   : > { %v290_v22 = vmul.f32 %v3298_v21, %v282_v4 }
 0x148   : > { %v295_v24 = vmul.f32 %v294_v20, %v290_v22 }
 0x14a   : > { %v300_v25 = vadd.f32 %v299_v23, %v295_v24  ;;  %v380_v24 = vld [vmem:[%s3976_s3 + $0x10] sm:$0xff] }
 0x14c   : > { %3052 = vmatmul.mubr.msk.f32.vlgmr.msra.gmra.mxu0 %vm276_vm0, %v300_v25 }
 0x14d   : > { %3056 = vmatprep.mubr.msk.f32.mxu0 %vm3404_vm1, %v3403_v8 }
 0x20c   : > { %v3556_v26 = vpop.f32.mrf.mxu0 }
 0x20d   : > { %547 = vrot.lane.b32.xlu0 %v3556_v26, %s3405_s14  ;;  %383 = vrot.lane.b32.xlu1 %v3556_v26, %s3406_s15 }
 0x20e   : > { %v3053_v27 = vpop.f32.mrf.mxu0 }
 0x211   : > { %549 = vrot.lane.b32.xlu1 %v3556_v26, %s3407_s16 }
 0x27f   : > { %v384_v28 = vpop.permute.xlu1 %383  ;;  %v548_v30 = vpop.permute.xlu0 %547 }
 0x280   : > { %3055 = vmatpush3.xpose.msk.msra.mxu0 %vm385_vm2, %v384_v28 }
 0x281   : > { %3064 = vmatprep.subr.mxu0 %v3403_v8 }
 0x283   : > { %3057 = vmatmul.mubr.msk.f32.vlgmr.msra.gmra.mxu0 %vm385_vm2, %v3556_v26  ;;  %v550_v29 = vpop.permute.xlu1 %549 }
 0x284   : > { %3065 = vmatpush3.xpose.msk.msra.mxu0 %vm385_vm2, %v550_v29  ;;  %3066 = vmatprep.mubr.msk.f32.mxu0 %vm3404_vm1, %v3403_v8 }
 0x285   : > { %3074 = vmatprep.subr.mxu0 %v3403_v8 }
 0x287   : > { %3067 = vmatmul.mubr.msk.f32.vlgmr.msra.gmra.mxu0 %vm385_vm2, %v548_v30 }
 0x288   : > { %3076 = vmatprep.mubr.msk.f32.mxu0 %vm3404_vm1, %v3403_v8  ;;  %3075 = vmatpush3.msra.mxu0 %v379_v56 }
 0x289   : > { %3084 = vmatprep.subr.mxu0 %v3403_v8 }
 0x343   : > { %v456_v31 = vpop.f32.mrf.mxu0 }
 0x344   : > { %v460_v32 = vsel %vm385_vm2, %v456_v31, -inf }
 0x345   : > { %461 = vmax.xlane.f32.xlu1 %v460_v32  ;;  %v3058_v33 = vpop.f32.mrf.mxu0 }
 0x347   : > { %v621_v34 = vpop.f32.mrf.mxu0 }
 0x348   : > { %v625_v35 = vsel %vm385_vm2, %v621_v34, -inf }
 0x349   : > { %626 = vmax.xlane.f32.xlu0 %v625_v35  ;;  %v3068_v36 = vpop.f32.mrf.mxu0 }
 0x34a   : > { %v381_v36 = vld [vmem:[%s3976_s3 + $0x18] sm:$0xff] }
 0x35f   : > { %636 = vrot.lane.b32.xlu0 %v3556_v26, %s3408_s17 }
 0x3ce   : > { %v462_v37 = vpop.xlane.xlu1 %461 }
 0x3cf   : > { %v463_v38 = vsub.f32 %v456_v31, %v462_v37 }
 0x3d1   : > { %v464_v39 = vmul.f32 1.442695, %v463_v38 }
 0x3d2   : > { %v627_v40 = vpop.xlane.xlu0 %626 }
 0x3d3   : > { %3299 = vpow2.f32 %v464_v39  ;;  %v628_v41 = vsub.f32 %v621_v34, %v627_v40 }
 0x3d5   : > { %v629_v42 = vmul.f32 1.442695, %v628_v41 }
 0x3d6   : > { %v637_v52 = vpop.permute.xlu0 %636 }
 0x3d7   : > { %3301 = vpow2.f32 %v629_v42 }
 0x3e0   : > { %v3300_v43 = vpop.eup %3299 }
 0x3e1   : > { %v466_v44 = vsel %vm385_vm2, %v3300_v43, 0.0 }
 0x3e2   : > { %467 = vadd.xlane.f32.xlu1 %v466_v44 }
 0x3e4   : > { %v3302_v45 = vpop.eup %3301 }
 0x3e5   : > { %v631_v46 = vsel %vm385_vm2, %v3302_v45, 0.0 }
 0x3e6   : > { %632 = vadd.xlane.f32.xlu1 %v631_v46 }
 0x3f7   : > { %471 = vrot.lane.b32.xlu1 %v3556_v26, %s3409_s18 }
 0x3fb   : > { %860 = vrot.lane.b32.xlu1 %v3556_v26, %s3410_s19 }
 0x3ff   : > { %858 = vrot.lane.b32.xlu1 %v3556_v26, %s3985_s20  ;;  %s3992_s20 = smov 40  }
 0x46b   : > { %v468_v47 = vpop.xlane.xlu1 %467 }
 0x46c   : > { %3303 = vrcp.f32 %v468_v47 }
 0x46f   : > { %v633_v48 = vpop.xlane.xlu1 %632 }
 0x470   : > { %3305 = vrcp.f32 %v633_v48 }
 0x473   : > { %v472_v49 = vpop.permute.xlu1 %471 }
 0x474   : > { %3060 = vmatpush3.msra.mxu1 %v472_v49 }
 0x475   : > { %3069 = vmatprep.subr.mxu1 %v3403_v8 }
 0x477   : > { %v861_v58 = vpop.permute.xlu1 %860 }
 0x479   : > { %v3304_v50 = vpop.eup %3303 }
 0x47a   : > { %v470_v51 = vmul.f32 %v3304_v50, %v3300_v43 }
 0x47b   : > { %v859_v62 = vpop.permute.xlu1 %858 }
 0x47c   : > { %3062 = vmatmul.mubr.msk.f32.vlgmr.msra.gmra.mxu1 %vm385_vm2, %v470_v51 }
 0x47d   : > { %v3306_v53 = vpop.eup %3305  ;;  %3070 = vmatpush3.msra.mxu1 %v637_v52  ;;  %3071 = vmatprep.mubr.msk.f32.mxu1 %vm3404_vm1, %v3403_v8 }
 0x47e   : > { %v635_v54 = vmul.f32 %v3306_v53, %v3302_v45  ;;  %3079 = vmatprep.subr.mxu1 %v3403_v8  ;;  %v1339_v45 = vsub.s32 2, %v3538_v16 }
 0x480   : > { %3072 = vmatmul.mubr.msk.f32.vlgmr.msra.gmra.mxu1 %vm385_vm2, %v635_v54  ;;  %v1340_v48 = vrot.slane %v3544_v18, %v1339_v45 }
 0x481   : > { %3081 = vmatprep.mubr.msk.f32.mxu1 %vm3404_vm1, %v3403_v8  ;;  %3080 = vmatpush3.msra.mxu1 %v378_v55 }
 0x482   : > { %3089 = vmatprep.subr.mxu1 %v3403_v8 }
 0x53c   : > { %v543_v57 = vpop.f32.mrf.mxu1 }
 0x53d   : > { %3082 = vmatmul.mubr.msk.f32.vlgmr.msra.gmra.mxu1 %vm385_vm2, %v543_v57 }
 0x53e   : > { %v3063_v59 = vpop.f32.mrf.mxu1  ;;  %3091 = vmatprep.mubr.msk.f32.mxu1 %vm3404_vm1, %v3403_v8 }
 0x53f   : > { %v1366_v59 = vld [vmem:[%s3977_s4 + $0x8] sm:$0xff] }
 0x540   : > { %v708_v60 = vpop.f32.mrf.mxu1 }
 0x541   : > { %3077 = vmatmul.mubr.msk.f32.vlgmr.msra.gmra.mxu0 %vm385_vm2, %v708_v60  ;;  %v1365_v60 = vld [vmem:[%s3977_s4] sm:$0xff] }
 0x542   : > { %3085 = vmatpush3.xpose.msk.msra.mxu0 %vm385_vm2, %v861_v58  ;;  %v3073_v61 = vpop.f32.mrf.mxu1  ;;  %3086 = vmatprep.mubr.msk.f32.mxu0 %vm3404_vm1, %v3403_v8  ;;  %v1368_v58 = vld [vmem:[%s3977_s4 + $0x18] sm:$0xff] }
 0x543   : > { %3094 = vmatprep.subr.mxu0 %v3403_v8 }
 0x545   : > { %3087 = vmatmul.mubr.msk.f32.vlgmr.msra.gmra.mxu0 %vm385_vm2, %v859_v62 }
 0x546   : > { %3096 = vmatprep.mubr.msk.f32.mxu0 %vm3404_vm1, %v3403_v8  ;;  %3095 = vmatpush3.msra.mxu0 %v380_v24 }
 0x547   : > { %3104 = vmatprep.subr.mxu0 %v3403_v8 }
 0x5fd   : > { %v854_v63 = vpop.f32.mrf.mxu1 }
 0x5ff   : > { %v3083_v1 = vpop.f32.mrf.mxu1 }
 0x600   : > { %v1357_v1 = vsub.s32 3, %v3538_v16 }
 0x601   : > { %v781_v2 = vpop.f32.mrf.mxu0 }
 0x602   : > { %v855_v3 = vadd.f32 %v854_v63, %v781_v2  ;;  %v1362_v2 = vsub.s32 4, %v3538_v16 }
 0x603   : > { %v3078_v4 = vpop.f32.mrf.mxu0 }
 0x605   : > { %v932_v5 = vpop.f32.mrf.mxu0 }
 0x606   : > { %v936_v6 = vsel %vm385_vm2, %v932_v5, -inf }
 0x607   : > { %937 = vmax.xlane.f32.xlu1 %v936_v6  ;;  %v3088_v7 = vpop.f32.mrf.mxu0  ;;  %v1363_v6 = vrot.slane %v3544_v18, %v1362_v2 }
 0x618   : > { %947 = vrot.lane.b32.xlu1 %v3556_v26, %s3982_s8  ;;  %s267_s8 = sand.u32 1, %s3393_s25  }
 0x61c   : > { %1097 = vrot.lane.b32.xlu1 %v3556_v26, %s3983_s9  ;;  %s2889_s9 = sshll.u32 %s267_s8, 3 }
 0x690   : > { %v938_v9 = vpop.xlane.xlu1 %937 }
 0x691   : > { %v939_v10 = vsub.f32 %v932_v5, %v938_v9 }
 0x693   : > { %v940_v11 = vmul.f32 1.442695, %v939_v10  ;;  %v1461_v10 = vld [vmem:[%s3979_s6 + $0x38] sm:$0xff] }
 0x694   : > { %v948_v12 = vpop.permute.xlu1 %947 }
 0x695   : > { %3307 = vpow2.f32 %v940_v11  ;;  %3090 = vmatpush3.msra.mxu1 %v948_v12  ;;  %v1460_v11 = vld [vmem:[%s3979_s6 + $0x30] sm:$0xff]  ;;  %v1459_v12 = vld [vmem:[%s3979_s6 + $0x28] sm:$0xff] }
 0x696   : > { %3099 = vmatprep.subr.mxu1 %v3403_v8 }
 0x698   : > { %v1098_v23 = vpop.permute.xlu1 %1097 }
 0x6a2   : > { %v3308_v13 = vpop.eup %3307 }
 0x6a3   : > { %v942_v14 = vsel %vm385_vm2, %v3308_v13, 0.0 }
 0x6a4   : > { %943 = vadd.xlane.f32.xlu0 %v942_v14  ;;  %v1457_v14 = vld [vmem:[%s3979_s6 + $0x18] sm:$0xff] }
 0x6ba   : > { %1099 = vrot.lane.b32.xlu0 %v3556_v26, %s3984_s13  ;;  %s2954_s13 = sshll.u32 %s3478_s28, 7  ;;  %s3416_s28 = smov [#allocation2]  }
 0x72d   : > { %v944_v15 = vpop.xlane.xlu0 %943 }
 0x72e   : > { %3309 = vrcp.f32 %v944_v15  ;;  %v1456_v15 = vld [vmem:[%s3979_s6 + $0x10] sm:$0xff] }
 0x731   : > { %v1100_v22 = vpop.permute.xlu0 %1099 }
 0x73b   : > { %v3310_v20 = vpop.eup %3309 }
 0x73c   : > { %v946_v21 = vmul.f32 %v3310_v20, %v3308_v13  ;;  %v1458_v13 = vld [vmem:[%s3979_s6 + $0x20] sm:$0xff]  ;;  %v1455_v20 = vld [vmem:[%s3979_s6 + $0x8] sm:$0xff] }
 0x73e   : > { %3092 = vmatmul.mubr.msk.f32.vlgmr.msra.gmra.mxu1 %vm385_vm2, %v946_v21  ;;  %v1454_v21 = vld [vmem:[%s3979_s6] sm:$0xff] }
 0x73f   : > { %3100 = vmatpush3.xpose.msk.msra.mxu1 %vm385_vm2, %v1100_v22  ;;  %3101 = vmatprep.mubr.msk.f32.mxu1 %vm3404_vm1, %v3403_v8  ;;  %v2908_v22 = vld [vmem:[%s3978_s5] ss:$0 sm:$0xff] }
 0x740   : > { %3109 = vmatprep.subr.mxu1 %v3403_v8 }
 0x742   : > { %3102 = vmatmul.mubr.msk.f32.vlgmr.msra.gmra.mxu1 %vm385_vm2, %v1098_v23 }
 0x743   : > { %3111 = vmatprep.mubr.msk.f32.mxu1 %vm3404_vm1, %v3403_v8  ;;  %3110 = vmatpush3.msra.mxu1 %v381_v36 }
 0x744   : > { %3125 = vmatprep.subr.mxu1 %v3403_v8 }
 0x7fe   : > { %v1019_v25 = vpop.f32.mrf.mxu1 }
 0x7ff   : > { %3097 = vmatmul.mubr.msk.f32.vlgmr.msra.gmra.mxu0 %vm385_vm2, %v1019_v25 }
 0x800   : > { %v3093_v27 = vpop.f32.mrf.mxu1  ;;  %3106 = vmatprep.mubr.msk.f32.mxu0 %vm3404_vm1, %v3403_v8 }
 0x802   : > { %v1171_v28 = vpop.f32.mrf.mxu1 }
 0x803   : > { %v1175_v29 = vsel %vm385_vm2, %v1171_v28, -inf }
 0x804   : > { %1176 = vmax.xlane.f32.xlu1 %v1175_v29  ;;  %v3103_v30 = vpop.f32.mrf.mxu1 }
 0x88d   : > { %v1177_v31 = vpop.xlane.xlu1 %1176 }
 0x88e   : > { %v1178_v32 = vsub.f32 %v1171_v28, %v1177_v31 }
 0x890   : > { %v1179_v33 = vmul.f32 1.442695, %v1178_v32  ;;  %v1539_v32 = vsub.s32 5, %v3538_v16 }
 0x892   : > { %3311 = vpow2.f32 %v1179_v33  ;;  %v1540_v33 = vrot.slane %v3544_v18, %v1539_v32 }
 0x89f   : > { %v3312_v34 = vpop.eup %3311 }
 0x8a0   : > { %v1181_v35 = vsel %vm385_vm2, %v3312_v34, 0.0 }
 0x8a1   : > { %1182 = vadd.xlane.f32.xlu0 %v1181_v35 }
 0x8b7   : > { %1186 = vrot.lane.b32.xlu0 %v3556_v26, %s3981_s23  ;;  %s3990_s23 = smov 56  }
 0x8bf   : > { %v1092_v37 = vpop.f32.mrf.mxu0 }
 0x8c0   : > { %v1096_v38 = vadd.f32 %v1092_v37, %v855_v3  ;;  %v1358_v3 = vrot.slane %v3544_v18, %v1357_v1  ;;  %v2915_v18 = vld [vmem:[%s3975_s2 + $0x38] sm:$0xff] }
 0x8c1   : > { %v3098_v39 = vpop.f32.mrf.mxu0 }
 0x92a   : > { %v1183_v40 = vpop.xlane.xlu0 %1182 }
 0x92b   : > { %3313 = vrcp.f32 %v1183_v40 }
 0x92e   : > { %v1187_v41 = vpop.permute.xlu0 %1186 }
 0x92f   : > { %3105 = vmatpush3.msra.mxu0 %v1187_v41 }
 0x930   : > { %3114 = vmatprep.subr.mxu0 %v3403_v8 }
 0x938   : > { %v3314_v42 = vpop.eup %3313 }
 0x939   : > { %v1185_v43 = vmul.f32 %v3314_v42, %v3312_v34 }
 0x93b   : > { %3107 = vmatmul.mubr.msk.f32.vlgmr.msra.gmra.mxu0 %vm385_vm2, %v1185_v43 }
 0x93c   : > { %3122 = vmatprep.mubr.msk.f32.mxu0 %vm3404_vm1, %v3403_v8  ;;  %3115 = vmatpush3.msra.mxu0 %v1368_v58 }
 0x93d   : > { %3116 = vmatprep.subr.mxu0 %v3403_v8 }
 0x9fb   : > { %v1258_v26 = vpop.f32.mrf.mxu0 }
 0x9fc   : > { %3112 = vmatmul.mubr.msk.f32.vlgmr.msra.gmra.mxu1 %vm385_vm2, %v1258_v26  ;;  %v2914_v26 = vld [vmem:[%s3975_s2 + $0x30] sm:$0xff] }
 0x9fd   : > { %v3108_v44 = vpop.f32.mrf.mxu0  ;;  %3141 = vmatprep.mubr.msk.f32.mxu1 %vm3404_vm1, %v3403_v8  ;;  %3126 = vmatpush3.msra.mxu1 %v1461_v10 }
 0x9fe   : > { %3127 = vmatprep.subr.mxu1 %v3403_v8  ;;  %v2913_v44 = vld [vmem:[%s3975_s2 + $0x28] sm:$0xff] }
 0x9ff   : > { %3128 = vmatpush3.msra.mxu1 %v1460_v11 }
 0xa00   : > { %3129 = vmatprep.subr.mxu1 %v3403_v8 }
 0xa01   : > { %3130 = vmatpush3.msra.mxu1 %v1459_v12 }
 0xa02   : > { %3131 = vmatprep.subr.mxu1 %v3403_v8 }
 0xa03   : > { %3132 = vmatpush3.msra.mxu1 %v1458_v13 }
 0xa04   : > { %3133 = vmatprep.subr.mxu1 %v3403_v8 }
 0xa05   : > { %3134 = vmatpush3.msra.mxu1 %v1457_v14 }
 0xa06   : > { %3135 = vmatprep.subr.mxu1 %v3403_v8 }
 0xa07   : > { %3136 = vmatpush3.msra.mxu1 %v1456_v15 }
 0xa08   : > { %3137 = vmatprep.subr.mxu1 %v3403_v8 }
 0xa09   : > { %3138 = vmatpush3.msra.mxu1 %v1455_v20 }
 0xa0a   : > { %3139 = vmatprep.subr.mxu1 %v3403_v8 }
 0xa0b   : > { %3140 = vmatpush3.msra.mxu1 %v1454_v21 }
 0xa0c   : > { %3160 = vmatprep.subr.mxu1 %v3403_v8 }
 0xabc   : > { %v1331_v46 = vpop.f32.mrf.mxu1 }
 0xabd   : > { %v1335_v47 = vadd.f32 %v1331_v46, %v1096_v38  ;;  %v2912_v46 = vld [vmem:[%s3975_s2 + $0x20] sm:$0xff] }
 0xabe   : > { %v3113_v49 = vpop.f32.mrf.mxu1 }
 0xabf   : > { %v1336_v50 = vadd.f32 %v1335_v47, %v3510_v0  ;;  %v1367_v0 = vld [vmem:[%s3977_s4 + $0x10] sm:$0xff] }
 0xac0   : > { %3117 = vmatpush3.msra.mxu0 %v1367_v0 }
 0xac1   : > { %v3658_v51 = vadd.f32 %v1340_v48, %v1336_v50  ;;  %3118 = vmatprep.subr.mxu0 %v3403_v8  ;;  %v3759_v50 = vld [vmem:[%s3974_s1 + $0x8] sm:$0x3f] }
 0xac2   : > { %3119 = vmatpush3.msra.mxu0 %v1366_v59 }
 0xac3   : > { %v1342_v52 = vsel %vm276_vm0, %v3658_v51, 0.0  ;;  %3120 = vmatprep.subr.mxu0 %v3403_v8 }
 0xac4   : > { %1343 = vadd.xlane.f32.xlu1 %v1342_v52  ;;  %3121 = vmatpush3.msra.mxu0 %v1365_v60 }
 0xac5   : > { %3144 = vmatprep.subr.mxu0 %v3403_v8 }
 0xb4d   : > { %v1344_v53 = vpop.xlane.xlu1 %1343 }
 0xb4e   : > { %v1345_v54 = vmul.f32 0.03125, %v1344_v53  ;;  %v1565_v53 = vrot.slane %v3759_v50, %v298_v19 }
 0xb50   : > { %v1346_v55 = vsub.f32 %v3658_v51, %v1345_v54 }
 0xb52   : > { %v1347_v56 = vmul.f32 %v1346_v55, %v1346_v55 }
 0xb54   : > { %v1348_v57 = vsel %vm276_vm0, %v1347_v56, 0.0 }
 0xb55   : > { %1349 = vadd.xlane.f32.xlu1 %v1348_v57 }
 0xbde   : > { %v1350_v61 = vpop.xlane.xlu1 %1349 }
 0xbdf   : > { %v1351_v62 = vmul.f32 0.03125, %v1350_v61 }
 0xbe1   : > { %v1352_v63 = vadd.f32 1e-05, %v1351_v62 }
 0xbe3   : > { %3315 = vrsqrt.f32 %v1352_v63 }
 0xbf0   : > { %v3316_v4 = vpop.eup %3315 }
 0xbf1   : > { %v1354_v5 = vmul.f32 %v3316_v4, %v1346_v55 }
 0xbf3   : > { %v1359_v7 = vmul.f32 %v1358_v3, %v1354_v5 }
 0xbf5   : > { %v1364_v9 = vadd.f32 %v1363_v6, %v1359_v7 }
 0xbf7   : > { %3123 = vmatmul.mubr.msk.f32.vlgmr.msra.gmra.mxu0 %vm276_vm0, %v1364_v9 }
 0xbf8   : > { %3152 = vmatprep.mubr.msk.f32.mxu0 %vm3404_vm1, %v3403_v8  ;;  %3145 = vmatpush3.msra.mxu0 %v2915_v18 }
 0xbf9   : > { %3146 = vmatprep.subr.mxu0 %v3403_v8 }
 0xbfa   : > { %3147 = vmatpush3.msra.mxu0 %v2914_v26 }
 0xbfb   : > { %3148 = vmatprep.subr.mxu0 %v3403_v8 }
 0xbfc   : > { %3149 = vmatpush3.msra.mxu0 %v2913_v44 }
 0xbfd   : > { %3150 = vmatprep.subr.mxu0 %v3403_v8 }
 0xbfe   : > { %3151 = vmatpush3.msra.mxu0 %v2912_v46 }
 0xbff   : > { %3155 = vmatprep.subr.mxu0 %v3403_v8 }
 0xcb7   : > { %v1445_v23 = vpop.f32.mrf.mxu0 }
 0xcb8   : > { %v1446_v24 = vadd.f32 %v2908_v22, %v1445_v23 }
 0xcb9   : > { %v3124_v25 = vpop.f32.mrf.mxu0 }
 0xcba   : > { %v1450_v27 = vmul.f32 0.70710677, %v1446_v24  ;;  %v1449_v29 = vmul.f32 0.5, %v1446_v24 }
 0xcbc   : > { %3317 = verf.f32 %v1450_v27 }
 0xcc9   : > { %v3318_v28 = vpop.eup %3317 }
 0xcca   : > { %v1452_v30 = vadd.f32 1.0, %v3318_v28  ;;  %v2917_v28 = vld [vmem:[%s3976_s3 + $0x20] sm:$0xff] }
 0xccc   : > { %v1453_v31 = vmul.f32 %v1452_v30, %v1449_v29  ;;  %v2918_v29 = vld [vmem:[%s3976_s3 + $0x28] sm:$0xff] }
 0xcce   : > { %3142 = vmatmul.mubr.msk.f32.vlgmr.msra.gmra.mxu1 %vm1462_vm3, %v1453_v31 }
 0xccf   : > { %3162 = vmatprep.mubr.msk.f32.mxu1 %vm3404_vm1, %v3403_v8 }
 0xd8e   : > { %v1532_v34 = vpop.f32.mrf.mxu1 }
 0xd8f   : > { %v1536_v35 = vadd.f32 %v1532_v34, %v3658_v51  ;;  %v1560_v51 = vrot.slane %v3759_v50, %v293_v17 }
 0xd90   : > { %v3143_v36 = vpop.f32.mrf.mxu1 }
 0xd91   : > { %v3734_v37 = vadd.f32 %v1540_v33, %v1536_v35 }
 0xd93   : > { %v1544_v38 = vsel %vm276_vm0, %v3734_v37, 0.0 }
 0xd94   : > { %1545 = vadd.xlane.f32.xlu1 %v1544_v38 }
 0xe1d   : > { %v1546_v39 = vpop.xlane.xlu1 %1545 }
 0xe1e   : > { %v1547_v40 = vmul.f32 0.03125, %v1546_v39 }
 0xe20   : > { %v1548_v41 = vsub.f32 %v3734_v37, %v1547_v40 }
 0xe22   : > { %v1549_v42 = vmul.f32 %v1548_v41, %v1548_v41 }
 0xe24   : > { %v1550_v43 = vsel %vm276_vm0, %v1549_v42, 0.0 }
 0xe25   : > { %1551 = vadd.xlane.f32.xlu1 %v1550_v43 }
 0xeae   : > { %v1552_v47 = vpop.xlane.xlu1 %1551 }
 0xeaf   : > { %v1553_v48 = vmul.f32 0.03125, %v1552_v47 }
 0xeb1   : > { %v1554_v49 = vadd.f32 1e-05, %v1553_v48 }
 0xeb3   : > { %3319 = vrsqrt.f32 %v1554_v49 }
 0xec0   : > { %v3320_v52 = vpop.eup %3319 }
 0xec1   : > { %v1556_v54 = vmul.f32 %v3320_v52, %v1548_v41 }
 0xec3   : > { %v1561_v55 = vmul.f32 %v1560_v51, %v1556_v54 }
 0xec5   : > { %v1566_v56 = vadd.f32 %v1565_v53, %v1561_v55 }
 0xec7   : > { %3153 = vmatmul.mubr.msk.f32.vlgmr.msra.gmra.mxu0 %vm276_vm0, %v1566_v56 }
 0xec8   : > { %3157 = vmatprep.mubr.msk.f32.mxu0 %vm3404_vm1, %v3403_v8 }
 0xf87   : > { %v3770_v57 = vpop.f32.mrf.mxu0 }
 0xf88   : > { %1816 = vrot.lane.b32.xlu0 %v3770_v57, %s3407_s16  ;;  %1651 = vrot.lane.b32.xlu1 %v3770_v57, %s3406_s15 }
 0xf89   : > { %v3154_v17 = vpop.f32.mrf.mxu0 }
 0xf8a   : > { %v2919_v17 = vld [vmem:[%s3976_s3 + $0x30] sm:$0xff] }
 0xf8c   : > { %1814 = vrot.lane.b32.xlu0 %v3770_v57, %s3405_s14  ;;  %s3988_s14 = smov 80  }
 0xffa   : > { %v1652_v19 = vpop.permute.xlu1 %1651  ;;  %v1817_v58 = vpop.permute.xlu0 %1816 }
 0xffb   : > { %3156 = vmatpush3.xpose.msk.msra.mxu0 %vm385_vm2, %v1652_v19 }
 0xffc   : > { %3165 = vmatprep.subr.mxu0 %v3403_v8 }
 0xffe   : > { %3158 = vmatmul.mubr.msk.f32.vlgmr.msra.gmra.mxu0 %vm385_vm2, %v3770_v57  ;;  %v1815_v0 = vpop.permute.xlu0 %1814 }
 0xfff   : > { %3166 = vmatpush3.xpose.msk.msra.mxu0 %vm385_vm2, %v1817_v58  ;;  %3167 = vmatprep.mubr.msk.f32.mxu0 %vm3404_vm1, %v3403_v8 }
0x1000   : > { %3175 = vmatprep.subr.mxu0 %v3403_v8 }
0x1002   : > { %3168 = vmatmul.mubr.msk.f32.vlgmr.msra.gmra.mxu0 %vm385_vm2, %v1815_v0 }
0x1003   : > { %3177 = vmatprep.mubr.msk.f32.mxu0 %vm3404_vm1, %v3403_v8  ;;  %3176 = vmatpush3.msra.mxu0 %v2918_v29 }
0x1004   : > { %3185 = vmatprep.subr.mxu0 %v3403_v8 }
0x10be   : > { %v1723_v59 = vpop.f32.mrf.mxu0 }
0x10bf   : > { %v1727_v60 = vsel %vm385_vm2, %v1723_v59, -inf }
0x10c0   : > { %1728 = vmax.xlane.f32.xlu0 %v1727_v60  ;;  %v3159_v61 = vpop.f32.mrf.mxu0 }
0x10c2   : > { %v1888_v62 = vpop.f32.mrf.mxu0 }
0x10c3   : > { %v1892_v63 = vsel %vm385_vm2, %v1888_v62, -inf }
0x10c4   : > { %1893 = vmax.xlane.f32.xlu1 %v1892_v63  ;;  %v3169_v3 = vpop.f32.mrf.mxu0 }
0x10d5   : > { %1903 = vrot.lane.b32.xlu1 %v3770_v57, %s3408_s17 }
0x10d9   : > { %2127 = vrot.lane.b32.xlu1 %v3770_v57, %s3410_s19  ;;  %s3989_s19 = smov 48  }
0x1149   : > { %v1729_v4 = vpop.xlane.xlu0 %1728 }
0x114a   : > { %v1730_v5 = vsub.f32 %v1723_v59, %v1729_v4 }
0x114c   : > { %v1731_v6 = vmul.f32 1.442695, %v1730_v5 }
0x114d   : > { %v1894_v7 = vpop.xlane.xlu1 %1893 }
0x114e   : > { %3321 = vpow2.f32 %v1731_v6  ;;  %v1895_v9 = vsub.f32 %v1888_v62, %v1894_v7  ;;  %v2920_v6 = vld [vmem:[%s3976_s3 + $0x38] sm:$0xff] }
0x1150   : > { %v1896_v10 = vmul.f32 1.442695, %v1895_v9 }
0x1151   : > { %v1904_v24 = vpop.permute.xlu1 %1903 }
0x1152   : > { %3323 = vpow2.f32 %v1896_v10 }
0x1155   : > { %v2128_v34 = vpop.permute.xlu1 %2127 }
0x115b   : > { %v3322_v11 = vpop.eup %3321 }
0x115c   : > { %v1733_v12 = vsel %vm385_vm2, %v3322_v11, 0.0 }
0x115d   : > { %1734 = vadd.xlane.f32.xlu0 %v1733_v12 }
0x115f   : > { %v3324_v13 = vpop.eup %3323 }
0x1160   : > { %v1898_v14 = vsel %vm385_vm2, %v3324_v13, 0.0 }
0x1161   : > { %1899 = vadd.xlane.f32.xlu0 %v1898_v14 }
0x1177   : > { %1738 = vrot.lane.b32.xlu0 %v3770_v57, %s3409_s18  ;;  %s2824_s18 = scalar_lea.hbm %s3980_s7, %s2954_s13 }
0x117b   : > { %2125 = vrot.lane.b32.xlu0 %v3770_v57, %s3988_s14  ;;  %s269_s14 = scalar_lea.vmem [#allocation2], %s2889_s9 }
0x117c   : > { %s2826_s15 = sshll.u32 %s269_s14, 4  ;;  %s2827_s15 = int_to_ptr.vmem [resolvable:$true] %s2826_s15 }
0x11e6   : > { %v1735_v15 = vpop.xlane.xlu0 %1734 }
0x11e7   : > { %3325 = vrcp.f32 %v1735_v15 }
0x11ea   : > { %v1900_v20 = vpop.xlane.xlu0 %1899 }
0x11eb   : > { %3327 = vrcp.f32 %v1900_v20 }
0x11ee   : > { %v1739_v21 = vpop.permute.xlu0 %1738 }
0x11ef   : > { %3161 = vmatpush3.msra.mxu1 %v1739_v21  ;;  %v2607_v21 = vrot.slane %v3759_v50, %v1339_v45  ;;  %v2940_v45 = vld [vmem:[%s3977_s4 + $0x38] sm:$0xff] }
0x11f0   : > { %3170 = vmatprep.subr.mxu1 %v3403_v8 }
0x11f2   : > { %v2126_v36 = vpop.permute.xlu0 %2125 }
0x11f4   : > { %v3326_v22 = vpop.eup %3325 }
0x11f5   : > { %v1737_v23 = vmul.f32 %v3326_v22, %v3322_v11 }
0x11f7   : > { %3163 = vmatmul.mubr.msk.f32.vlgmr.msra.gmra.mxu1 %vm385_vm2, %v1737_v23 }
0x11f8   : > { %v3328_v25 = vpop.eup %3327  ;;  %3171 = vmatpush3.msra.mxu1 %v1904_v24  ;;  %3172 = vmatprep.mubr.msk.f32.mxu1 %vm3404_vm1, %v3403_v8 }
0x11f9   : > { %v1902_v27 = vmul.f32 %v3328_v25, %v3324_v13  ;;  %3180 = vmatprep.subr.mxu1 %v3403_v8 }
0x11fb   : > { %3173 = vmatmul.mubr.msk.f32.vlgmr.msra.gmra.mxu1 %vm385_vm2, %v1902_v27 }
0x11fc   : > { %3182 = vmatprep.mubr.msk.f32.mxu1 %vm3404_vm1, %v3403_v8  ;;  %3181 = vmatpush3.msra.mxu1 %v2917_v28 }
0x11fd   : > { %3190 = vmatprep.subr.mxu1 %v3403_v8 }
0x12b7   : > { %v1810_v30 = vpop.f32.mrf.mxu1 }
0x12b8   : > { %3183 = vmatmul.mubr.msk.f32.vlgmr.msra.gmra.mxu1 %vm385_vm2, %v1810_v30 }
0x12b9   : > { %v3164_v31 = vpop.f32.mrf.mxu1  ;;  %3192 = vmatprep.mubr.msk.f32.mxu1 %vm3404_vm1, %v3403_v8 }
0x12bb   : > { %v1975_v33 = vpop.f32.mrf.mxu1 }
0x12bc   : > { %3178 = vmatmul.mubr.msk.f32.vlgmr.msra.gmra.mxu0 %vm385_vm2, %v1975_v33  ;;  %v2938_v33 = vld [vmem:[%s3977_s4 + $0x28] sm:$0xff] }
0x12bd   : > { %3186 = vmatpush3.xpose.msk.msra.mxu0 %vm385_vm2, %v2128_v34  ;;  %v3174_v35 = vpop.f32.mrf.mxu1  ;;  %3187 = vmatprep.mubr.msk.f32.mxu0 %vm3404_vm1, %v3403_v8  ;;  %v2937_v34 = vld [vmem:[%s3977_s4 + $0x20] sm:$0xff] }
0x12be   : > { %3195 = vmatprep.subr.mxu0 %v3403_v8 }
0x12c0   : > { %3188 = vmatmul.mubr.msk.f32.vlgmr.msra.gmra.mxu0 %vm385_vm2, %v2126_v36 }
0x12c1   : > { %3197 = vmatprep.mubr.msk.f32.mxu0 %vm3404_vm1, %v3403_v8  ;;  %3196 = vmatpush3.msra.mxu0 %v2919_v17 }
0x12c2   : > { %3205 = vmatprep.subr.mxu0 %v3403_v8 }
0x1378   : > { %v2121_v38 = vpop.f32.mrf.mxu1 }
0x137a   : > { %v3184_v39 = vpop.f32.mrf.mxu1 }
0x137b   : > { %v2625_v39 = vrot.slane %v3759_v50, %v1357_v1  ;;  %v2950_v1 = vld [vmem:[%s3979_s6 + $0x70] sm:$0xff] }
0x137c   : > { %v2048_v40 = vpop.f32.mrf.mxu0 }
0x137d   : > { %v2122_v41 = vadd.f32 %v2121_v38, %v2048_v40 }
0x137e   : > { %v3179_v42 = vpop.f32.mrf.mxu0 }
0x137f   : > { %v2630_v42 = vrot.slane %v3759_v50, %v1362_v2  ;;  %v2949_v2 = vld [vmem:[%s3979_s6 + $0x68] sm:$0xff] }
0x1380   : > { %v2199_v43 = vpop.f32.mrf.mxu0 }
0x1381   : > { %v2203_v18 = vsel %vm385_vm2, %v2199_v43, -inf }
0x1382   : > { %2204 = vmax.xlane.f32.xlu1 %v2203_v18  ;;  %v3189_v26 = vpop.f32.mrf.mxu0 }
0x1383   : > { %v2951_v26 = vld [vmem:[%s3979_s6 + $0x78] sm:$0xff] }
0x1393   : > { %2366 = vrot.lane.b32.xlu1 %v3770_v57, %s3989_s19  ;;  %s2813_s19 = scalar_lea.sflag [#allocation3], %s267_s8 }
0x1397   : > { %2364 = vrot.lane.b32.xlu1 %v3770_v57, %s3990_s23  ;;  %s3341_s23 = scalar_lea.vmem %s2827_s15, 128 }
0x1398   : > { %p3342_p11 = scmp.ne.s32.totalorder %s2827_s15, %s3341_s23 }
0x139a   : > { %p3343_p12 = pnand %p3342_p11, %p3495_p5 }
0x139c   : > { %p3344_p13 = pneg %p3343_p12 }
0x140b   : > { %v2205_v44 = vpop.xlane.xlu1 %2204 }
0x140c   : > { %v2206_v46 = vsub.f32 %v2199_v43, %v2205_v44  ;;  %v2948_v44 = vld [vmem:[%s3979_s6 + $0x60] sm:$0xff] }
0x140e   : > { %v2207_v47 = vmul.f32 1.442695, %v2206_v46  ;;  %v2947_v46 = vld [vmem:[%s3979_s6 + $0x58] sm:$0xff] }
0x140f   : > { %v2367_v54 = vpop.permute.xlu1 %2366 }
0x1410   : > { %3329 = vpow2.f32 %v2207_v47  ;;  %v2946_v47 = vld [vmem:[%s3979_s6 + $0x50] sm:$0xff] }
0x1413   : > { %v2365_v56 = vpop.permute.xlu1 %2364 }
0x141d   : > { %v3330_v48 = vpop.eup %3329 }
0x141e   : > { %v2209_v49 = vsel %vm385_vm2, %v3330_v48, 0.0 }
0x141f   : > { %2210 = vadd.xlane.f32.xlu0 %v2209_v49  ;;  %v2944_v49 = vld [vmem:[%s3979_s6 + $0x40] sm:$0xff] }
0x1435   : > { %2214 = vrot.lane.b32.xlu0 %v3770_v57, %s3991_s22  ;;  %s3345_s22 = sshll.u32 %s3416_s28, 4  ;;  %s3346_s22 = int_to_ptr.vmem [resolvable:$false] %s3345_s22 }
0x1436   : > { %s3347_s29 = scalar_lea.vmem %s3346_s22, 256  ;;  %p3348_p0 = scmp.lt.s32.totalorder %s2827_s15, %s3346_s22 }
0x1437   : > { %p3349_p1 = scmp.lt.s32.totalorder %s3347_s29, %s3341_s23 }
0x1439   : > { %p3350_p2 = por %p3349_p1, %p3348_p0 }
0x143b   : > { %p3351_p3 = pnand %p3350_p2, %p3344_p13 }
0x14a8   : > { %v2211_v51 = vpop.xlane.xlu0 %2210 }
0x14a9   : > { %3331 = vrcp.f32 %v2211_v51  ;;  %v2942_v51 = vld [vmem:[%s3978_s5 + $0x1] ss:$0 sm:$0xff] }
0x14ac   : > { %v2215_v52 = vpop.permute.xlu0 %2214 }
0x14ad   : > { %3191 = vmatpush3.msra.mxu1 %v2215_v52 }
0x14ae   : > { %3200 = vmatprep.subr.mxu1 %v3403_v8 }
0x14b6   : > { %v3332_v53 = vpop.eup %3331 }
0x14b7   : > { %v2213_v55 = vmul.f32 %v3332_v53, %v3330_v48  ;;  %v2945_v48 = vld [vmem:[%s3979_s6 + $0x48] sm:$0xff] }
0x14b9   : > { %3193 = vmatmul.mubr.msk.f32.vlgmr.msra.gmra.mxu1 %vm385_vm2, %v2213_v55 }
0x14ba   : > { %3201 = vmatpush3.xpose.msk.msra.mxu1 %vm385_vm2, %v2367_v54  ;;  %3202 = vmatprep.mubr.msk.f32.mxu1 %vm3404_vm1, %v3403_v8 }
0x14bb   : > { %3210 = vmatprep.subr.mxu1 %v3403_v8 }
0x14bd   : > { %3203 = vmatmul.mubr.msk.f32.vlgmr.msra.gmra.mxu1 %vm385_vm2, %v2365_v56 }
0x14be   : > { %3212 = vmatprep.mubr.msk.f32.mxu1 %vm3404_vm1, %v3403_v8  ;;  %3211 = vmatpush3.msra.mxu1 %v2920_v6 }
0x14bf   : > { %3226 = vmatprep.subr.mxu1 %v3403_v8 }
0x1579   : > { %v2286_v19 = vpop.f32.mrf.mxu1 }
0x157a   : > { %3198 = vmatmul.mubr.msk.f32.vlgmr.msra.gmra.mxu0 %vm385_vm2, %v2286_v19 }
0x157b   : > { %v3194_v58 = vpop.f32.mrf.mxu1  ;;  %3207 = vmatprep.mubr.msk.f32.mxu0 %vm3404_vm1, %v3403_v8 }
0x157d   : > { %v2438_v0 = vpop.f32.mrf.mxu1 }
0x157e   : > { %v2442_v59 = vsel %vm385_vm2, %v2438_v0, -inf }
0x157f   : > { %2443 = vmax.xlane.f32.xlu0 %v2442_v59  ;;  %v3204_v60 = vpop.f32.mrf.mxu1 }
0x1595   : > { %2453 = vrot.lane.b32.xlu0 %v3770_v57, %s3992_s20 }
0x1608   : > { %v2444_v61 = vpop.xlane.xlu0 %2443 }
0x1609   : > { %v2445_v62 = vsub.f32 %v2438_v0, %v2444_v61 }
0x160b   : > { %v2446_v63 = vmul.f32 1.442695, %v2445_v62 }
0x160c   : > { %v2454_v3 = vpop.permute.xlu0 %2453 }
0x160d   : > { %3333 = vpow2.f32 %v2446_v63  ;;  %3206 = vmatpush3.msra.mxu0 %v2454_v3 }
0x160e   : > { %3215 = vmatprep.subr.mxu0 %v3403_v8 }
0x161a   : > { %v3334_v4 = vpop.eup %3333 }
0x161b   : > { %v2448_v5 = vsel %vm385_vm2, %v3334_v4, 0.0 }
0x161c   : > { %2449 = vadd.xlane.f32.xlu1 %v2448_v5 }
0x163a   : > { %v2359_v57 = vpop.f32.mrf.mxu0 }
0x163b   : > { %v2363_v7 = vadd.f32 %v2359_v57, %v2122_v41 }
0x163c   : > { %v3199_v9 = vpop.f32.mrf.mxu0 }
0x16a5   : > { %v2450_v10 = vpop.xlane.xlu1 %2449 }
0x16a6   : > { %3335 = vrcp.f32 %v2450_v10 }
0x16b3   : > { %v3336_v11 = vpop.eup %3335 }
0x16b4   : > { %v2452_v12 = vmul.f32 %v3336_v11, %v3334_v4 }
0x16b6   : > { %3208 = vmatmul.mubr.msk.f32.vlgmr.msra.gmra.mxu0 %vm385_vm2, %v2452_v12 }
0x16b7   : > { %3223 = vmatprep.mubr.msk.f32.mxu0 %vm3404_vm1, %v3403_v8  ;;  %3216 = vmatpush3.msra.mxu0 %v2940_v45 }
0x16b8   : > { %3217 = vmatprep.subr.mxu0 %v3403_v8 }
0x1776   : > { %v2525_v13 = vpop.f32.mrf.mxu0 }
0x1777   : > { %3213 = vmatmul.mubr.msk.f32.vlgmr.msra.gmra.mxu1 %vm385_vm2, %v2525_v13 }
0x1778   : > { %v3209_v14 = vpop.f32.mrf.mxu0  ;;  %3242 = vmatprep.mubr.msk.f32.mxu1 %vm3404_vm1, %v3403_v8  ;;  %3227 = vmatpush3.msra.mxu1 %v2951_v26 }
0x1779   : > { %3228 = vmatprep.subr.mxu1 %v3403_v8 }
0x177a   : > { %3229 = vmatpush3.msra.mxu1 %v2950_v1 }
0x177b   : > { %3230 = vmatprep.subr.mxu1 %v3403_v8 }
0x177c   : > { %3231 = vmatpush3.msra.mxu1 %v2949_v2 }
0x177d   : > { %3232 = vmatprep.subr.mxu1 %v3403_v8 }
0x177e   : > { %3233 = vmatpush3.msra.mxu1 %v2948_v44 }
0x177f   : > { %3234 = vmatprep.subr.mxu1 %v3403_v8 }
0x1780   : > { %3235 = vmatpush3.msra.mxu1 %v2947_v46 }
0x1781   : > { %3236 = vmatprep.subr.mxu1 %v3403_v8 }
0x1782   : > { %3237 = vmatpush3.msra.mxu1 %v2946_v47 }
0x1783   : > { %3238 = vmatprep.subr.mxu1 %v3403_v8 }
0x1784   : > { %3239 = vmatpush3.msra.mxu1 %v2945_v48 }
0x1785   : > { %3240 = vmatprep.subr.mxu1 %v3403_v8 }
0x1786   : > { %3241 = vmatpush3.msra.mxu1 %v2944_v49 }
0x1837   : > { %v2598_v15 = vpop.f32.mrf.mxu1 }
0x1838   : > { %v2602_v20 = vadd.f32 %v2598_v15, %v2363_v7 }
0x1839   : > { %v3214_v22 = vpop.f32.mrf.mxu1 }
0x183a   : > { %v2603_v23 = vadd.f32 %v2602_v20, %v3734_v37  ;;  %v2939_v37 = vld [vmem:[%s3977_s4 + $0x30] sm:$0xff] }
0x183b   : > { %3218 = vmatpush3.msra.mxu0 %v2939_v37 }
0x183c   : > { %v3871_v24 = vadd.f32 %v2607_v21, %v2603_v23  ;;  %3219 = vmatprep.subr.mxu0 %v3403_v8 }
0x183d   : > { %3220 = vmatpush3.msra.mxu0 %v2938_v33 }
0x183e   : > { %v2609_v25 = vsel %vm276_vm0, %v3871_v24, 0.0  ;;  %3221 = vmatprep.subr.mxu0 %v3403_v8  ;;  %v2809_v8 = vrot.slane %v3759_v50, %v1539_v32 }
0x183f   : > { %2610 = vadd.xlane.f32.xlu1 %v2609_v25  ;;  %3222 = vmatpush3.msra.mxu0 %v2937_v34 }
0x18c8   : > { %v2611_v27 = vpop.xlane.xlu1 %2610 }
0x18c9   : > { %v2612_v28 = vmul.f32 0.03125, %v2611_v27 }
0x18cb   : > { %v2613_v29 = vsub.f32 %v3871_v24, %v2612_v28 }
0x18cd   : > { %v2614_v30 = vmul.f32 %v2613_v29, %v2613_v29 }
0x18cf   : > { %v2615_v31 = vsel %vm276_vm0, %v2614_v30, 0.0 }
0x18d0   : > { %2616 = vadd.xlane.f32.xlu1 %v2615_v31 }
0x1959   : > { %v2617_v35 = vpop.xlane.xlu1 %2616 }
0x195a   : > { %v2618_v36 = vmul.f32 0.03125, %v2617_v35 }
0x195c   : > { %v2619_v38 = vadd.f32 1e-05, %v2618_v36 }
0x195e   : > { %3337 = vrsqrt.f32 %v2619_v38 }
0x196b   : > { %v3338_v40 = vpop.eup %3337 }
0x196c   : > { %v2621_v41 = vmul.f32 %v3338_v40, %v2613_v29 }
0x196e   : > { %v2626_v43 = vmul.f32 %v2625_v39, %v2621_v41 }
0x1970   : > { %v2631_v18 = vadd.f32 %v2630_v42, %v2626_v43 }
0x1972   : > { %3224 = vmatmul.mubr.msk.f32.vlgmr.msra.gmra.mxu0 %vm276_vm0, %v2631_v18 }
0x1a32   : > { %v2714_v52 = vpop.f32.mrf.mxu0 }
0x1a33   : > { %v2715_v53 = vadd.f32 %v2942_v51, %v2714_v52 }
0x1a34   : > { %v3225_v54 = vpop.f32.mrf.mxu0 }
0x1a35   : > { %v2719_v55 = vmul.f32 0.70710677, %v2715_v53  ;;  %v2718_v17 = vmul.f32 0.5, %v2715_v53 }
0x1a37   : > { %3339 = verf.f32 %v2719_v55 }
0x1a44   : > { %v3340_v56 = vpop.eup %3339 }
0x1a45   : > { %v2721_v19 = vadd.f32 1.0, %v3340_v56 }
0x1a47   : > { %v2722_v58 = vmul.f32 %v2721_v19, %v2718_v17 }
0x1a49   : > { %3243 = vmatmul.mubr.msk.f32.vlgmr.msra.gmra.mxu1 %vm1462_vm3, %v2722_v58 }
0x1b09   : > { %v2801_v0 = vpop.f32.mrf.mxu1 }
0x1b0a   : > { %v2805_v59 = vadd.f32 %v2801_v0, %v3871_v24 }
0x1b0b   : > { %v3244_v60 = vpop.f32.mrf.mxu1 }
0x1b0c   : > { %v2810_v61 = vadd.f32 %v2809_v8, %v2805_v59 }
0x1b0e   : > { %2811 = vst.msk [vmem:[%s269_s14] sm:$0xff] %vm276_vm0, %v2810_v61 }
0x1b0f   : > { %3354 = shalt.err (!%p3351_p3)
}
0x1b10   : > { %s3355_s21 = scalar_lea.hbm %s2824_s18, 128  ;;  %s3359_s9 = scalar_lea.hbm %s3980_s7, 256 }
0x1b11   : > { %p3356_p4 = scmp.ne.s32.totalorder %s2824_s18, %s3355_s21  ;;  %p3360_p9 = scmp.lt.s32.totalorder %s2824_s18, %s3980_s7 }
0x1b12   : > { %p3361_p10 = scmp.lt.s32.totalorder %s3359_s9, %s3355_s21 }
0x1b13   : > { %p3357_p7 = pnand %p3356_p4, %p3495_p5 }
0x1b14   : > { %p3362_p11 = por %p3361_p10, %p3360_p9 }
0x1b15   : > { %p3358_p8 = pneg %p3357_p7 }
0x1b17   : > { %p3363_p12 = pnand %p3362_p11, %p3358_p8 }
0x1b19   : > { %3366 = shalt.err (!%p3363_p12)
}
0x1b1a   : > { %3245 = dma.vmem_to_hbm [thread:$0]  (%p3495_p5), %s2827_s15, 128, %s2824_s18, %s2813_s19  }
0x1b1b PF: > { %p3251_p13 = scmp.ge.s32.totalorder %s3401_s27, 2  ;;  %s2838_s16 = sand.u32 1, %s3389_s24  }
0x1b1c   : > { %s2839_s17 = scalar_lea.sflag [#allocation3], %s2838_s16 }
0x1b1d   : > { %p3248_p0 = pnand %p3251_p13, %p3499_p6 }
0x1b1f   : > { %p3249_p1 = pneg %p3248_p0 }
0x1b21   : > { %3384 = dma.done.wait (%p3249_p1), %s2839_s17, 128  }
0x1b22   : > { %3386 = vsyncadd (%p3249_p1), %s2839_s17, 4294967168  ;;  %p17_p2 = scmp.ge.s32.totalorder %s3482_s30, 4   ;;  %s3993_s24 = smov %s3393_s25 }
0x1b23   : > { %s3994_s25 = smov %s3397_s26  ;;  %s3995_s26 = smov %s3493_s10 }
0x1b24   : > { %s3996_s27 = smov %s3482_s30  ;;  %19 = sbr.rel (!%p17_p2) target bundleno = 3 (0x3), region = 89 }
0x1b29   :  { %2844 = vsyncpa [#allocation3], 1 }
0x1b2a   :  { %2846 = vsyncpa [#allocation3 + $0x1], 1 }

</bundles_post_ra>
